<compile_context>
chip_gen: v7x
topology: tpu7x:2x2x1
jax: 0.10.0
libtpu: 0.0.40
codegen_flags: <defaults>
</compile_context>

<pallas_src>
import functools

import jax
import jax.numpy as jnp
from jax.experimental import pallas as pl
from jax.experimental.pallas import tpu as pltpu

# Padded (lane-dense, (8,128)-tile aligned) dimensions used inside the kernel.
KDIM_PAD = 128   # 9 * C_in = 36  -> 128
CMID_PAD = 128   # C_mid    = 8   -> 128
K_PAD = 128      # K        = 10  -> 128
B_TILE = 8       # images per grid step (sublane-aligned output block)


# ---------------------------------------------------------------------------
# Fused kernel: per grid step (B_TILE images)
#   patches (B_TILE*HW, KDIM_PAD) @ w1 (KDIM_PAD, CMID_PAD) + b1 -> ReLU
#   per-image mean over HW (global average pool)                 -> (B_TILE, CMID_PAD)
#   @ w2 (CMID_PAD, K_PAD) + b2                                  -> logits
#   numerically-stable softmax over classes                      -> (B_TILE, K_PAD)
# ---------------------------------------------------------------------------
def fused_forward_kernel(p_ref, w1_ref, b1_ref, w2_ref, b2_ref, o_ref, *, hw):
    patches = p_ref[...]                                      # (B_TILE*HW, KDIM_PAD)
    h = jnp.dot(patches, w1_ref[...],
                preferred_element_type=jnp.float32)           # (B_TILE*HW, CMID_PAD)
    h = jnp.maximum(h + b1_ref[...], 0.0)                     # fused bias + ReLU
    # Global average pool per image (reshape splits sublanes at a multiple of
    # 8 -> no (8,128) tile crossing, stays a cheap in-VMEM view).
    pooled = jnp.sum(h.reshape(B_TILE, hw, CMID_PAD), axis=1) * (1.0 / hw)
    logits = jnp.dot(pooled, w2_ref[...],
                     preferred_element_type=jnp.float32) + b2_ref[...]
    m = jnp.max(logits, axis=1, keepdims=True)                # stable softmax
    e = jnp.exp(logits - m)                                   # padded cols -> 0
    o_ref[...] = e / jnp.sum(e, axis=1, keepdims=True)        # (B_TILE, K_PAD)


def fused_forward_pallas(patches_pad, w1p, b1p, w2p, b2p, hw):
    """patches_pad: (NB_pad*HW, KDIM_PAD) f32.  Returns (NB_pad, K_PAD) probs."""
    total_rows = patches_pad.shape[0]
    nb_pad = total_rows // hw
    n_tiles = nb_pad // B_TILE
    kernel = functools.partial(fused_forward_kernel, hw=hw)
    return pl.pallas_call(
        kernel,
        out_shape=jax.ShapeDtypeStruct((nb_pad, K_PAD), jnp.float32),
        grid=(n_tiles,),
        in_specs=[
            pl.BlockSpec((B_TILE * hw, KDIM_PAD), lambda i: (i, 0)),
            pl.BlockSpec((KDIM_PAD, CMID_PAD), lambda i: (0, 0)),
            pl.BlockSpec((1, CMID_PAD), lambda i: (0, 0)),
            pl.BlockSpec((CMID_PAD, K_PAD), lambda i: (0, 0)),
            pl.BlockSpec((1, K_PAD), lambda i: (0, 0)),
        ],
        out_specs=pl.BlockSpec((B_TILE, K_PAD), lambda i: (i, 0)),
        compiler_params=pltpu.CompilerParams(
            dimension_semantics=("parallel",)),   # shard batch tiles across TCs
    )(patches_pad, w1p, b1p, w2p, b2p)


# ---------------------------------------------------------------------------
# Plain-JAX glue
# ---------------------------------------------------------------------------
def im2col_3x3_same(x_nhwc):
    """Extract 3x3 'same' patches. x: (N,H,W,C) -> (N*H*W, 9*C)."""
    N, H, W, C = x_nhwc.shape
    xp = jnp.pad(x_nhwc, ((0, 0), (1, 1), (1, 1), (0, 0)))
    cols = [xp[:, i:i + H, j:j + W, :] for i in range(3) for j in range(3)]
    patches = jnp.stack(cols, axis=-2)                        # (N, H, W, 9, C)
    return patches.reshape(N * H * W, 9 * C)


def pad_params(w1, b1, w2, b2):
    """Zero-pad params to lane-dense shapes. Padded K logits get -1e30 bias so
    they contribute exp(...) == 0 to the softmax normalization."""
    Kdim, C_mid = w1.shape
    K = w2.shape[1]
    w1p = jnp.zeros((KDIM_PAD, CMID_PAD), jnp.float32).at[:Kdim, :C_mid].set(w1)
    b1p = jnp.zeros((1, CMID_PAD), jnp.float32).at[:, :C_mid].set(b1)
    w2p = jnp.zeros((CMID_PAD, K_PAD), jnp.float32).at[:C_mid, :K].set(w2)
    b2p = jnp.full((1, K_PAD), -1e30, jnp.float32).at[:, :K].set(b2)
    return w1p, b1p, w2p, b2p


@functools.partial(jax.jit, static_argnames=("num_classes",))
def constraintmatch_forward(images_nchw, padded_params, num_classes):
    """images: (NB, C, H, W) float32 (PyTorch NCHW).  Returns (NB, K) probs."""
    w1p, b1p, w2p, b2p = padded_params
    NB, C, H, W = images_nchw.shape
    hw = H * W
    x = jnp.transpose(images_nchw, (0, 2, 3, 1))              # NCHW -> NHWC
    patches = im2col_3x3_same(x)                              # (NB*H*W, 9*C)
    # TODO(synk): for realistic image sizes, do the 9-tap expansion in-kernel
    # (pltpu.roll on NHWC tiles) instead of materializing im2col in HBM.
    patches = jnp.pad(patches, ((0, 0), (0, KDIM_PAD - patches.shape[1])))
    nb_pad = ((NB + B_TILE - 1) // B_TILE) * B_TILE           # pad batch to tile
    if nb_pad != NB:
        patches = jnp.pad(patches, ((0, (nb_pad - NB) * hw), (0, 0)))
    probs_pad = fused_forward_pallas(patches, w1p, b1p, w2p, b2p, hw)
    return probs_pad[:NB, :num_classes]                       # slice real NB, K


def reference_forward(images_nchw, params):
    """Pure-JAX reference (unpadded) used only for a correctness check."""
    w1, b1, w2, b2 = params
    N, C, H, W = images_nchw.shape
    x = jnp.transpose(images_nchw, (0, 2, 3, 1))
    patches = im2col_3x3_same(x)
    feats = jnp.maximum(patches @ w1 + b1, 0.0).reshape(N, H * W, w1.shape[1])
    pooled = feats.mean(axis=1)
    logits = pooled @ w2 + b2
    return jax.nn.softmax(logits, axis=1)


if __name__ == "__main__":
    # Small shapes consistent with the module: batch=2, channels=4, spatial=16.
    N, C_in, H, W = 2, 4, 16, 16
    C_mid, K = 8, 10

    key = jax.random.PRNGKey(0)
    k_img, k_w1, k_b1, k_w2, k_b2, k_weak, k_strong = jax.random.split(key, 7)

    # Deterministic synthetic parameters (conv weight in im2col layout
    # (kh*kw*C_in, C_mid); equivalent to torch (C_mid, C_in, 3, 3) transposed).
    w1 = jax.random.normal(k_w1, (9 * C_in, C_mid), jnp.float32) * 0.1
    b1 = jax.random.normal(k_b1, (1, C_mid), jnp.float32) * 0.1
    w2 = jax.random.normal(k_w2, (C_mid, K), jnp.float32) * 0.1
    b2 = jax.random.normal(k_b2, (1, K), jnp.float32) * 0.1
    params = (w1, b1, w2, b2)
    padded_params = pad_params(w1, b1, w2, b2)

    # Training-style batch: supervised images + weakly / strongly augmented.
    images = jax.random.normal(k_img, (N, C_in, H, W), jnp.float32)
    img_weak = jax.random.normal(k_weak, (N, C_in, H, W), jnp.float32)
    img_strong = jax.random.normal(k_strong, (N, C_in, H, W), jnp.float32)

    # Batch all three passes into ONE forward (3x fewer Pallas dispatches).
    all_images = jnp.concatenate([images, img_weak, img_strong], axis=0)
    all_probs = constraintmatch_forward(all_images, padded_params, K)
    out_sup, out_weak, out_strong = jnp.split(all_probs, 3, axis=0)
    outs = {'out': out_sup, 'out_weak': out_weak, 'out_strong': out_strong}

    for v in outs.values():
        jax.block_until_ready(v)

    # Sanity check against a pure-JAX reference (f32 path, 1e-5 tolerance).
    ref_sup = reference_forward(images, params)
    ref_weak = reference_forward(img_weak, params)
    ref_strong = reference_forward(img_strong, params)
    assert out_sup.shape == (N, K)
    assert jnp.allclose(out_sup, ref_sup, atol=1e-5, rtol=1e-5)
    assert jnp.allclose(out_weak, ref_weak, atol=1e-5, rtol=1e-5)
    assert jnp.allclose(out_strong, ref_strong, atol=1e-5, rtol=1e-5)
    assert jnp.allclose(all_probs.sum(axis=1), 1.0, atol=1e-5)

    # TODO(synk): loss_function / Evaluator (Hungarian assignment, pandas
    # logging) has no Pallas equivalent and is not part of forward().
    print("KERNEL_OK")
</pallas_src>

<mosaic_0001>
module attributes {stable_mosaic.version = 11 : i64} {
  func.func @fused_forward_kernel(%arg0: i32, %arg1: memref<2048x128xf32, #tpu.memory_space<vmem>>, %arg2: memref<128x128xf32, #tpu.memory_space<vmem>>, %arg3: memref<1x128xf32, #tpu.memory_space<vmem>>, %arg4: memref<128x128xf32, #tpu.memory_space<vmem>>, %arg5: memref<1x128xf32, #tpu.memory_space<vmem>>, %arg6: memref<8x128xf32, #tpu.memory_space<vmem>>) attributes {dimension_semantics = [#tpu.dimension_semantics<parallel>], iteration_bounds = array<i64: 1>, scalar_prefetch = 0 : i64, scratch_operands = 0 : i64, tpu.core_type = #tpu.core_type<tc>, window_params = [{transform_indices = @transform_0, window_bounds = array<i64: 2048, 128>}, {pipeline_mode = #tpu.pipeline_mode<synchronous>, transform_indices = @transform_1, window_bounds = array<i64: 128, 128>}, {pipeline_mode = #tpu.pipeline_mode<synchronous>, transform_indices = @transform_2, window_bounds = array<i64: 1, 128>}, {pipeline_mode = #tpu.pipeline_mode<synchronous>, transform_indices = @transform_3, window_bounds = array<i64: 128, 128>}, {pipeline_mode = #tpu.pipeline_mode<synchronous>, transform_indices = @transform_4, window_bounds = array<i64: 1, 128>}, {transform_indices = @transform_5, window_bounds = array<i64: 8, 128>}]} {
    %c0 = arith.constant 0 : index
    %c0_0 = arith.constant 0 : index
    %0 = vector.load %arg1[%c0, %c0_0] : memref<2048x128xf32, #tpu.memory_space<vmem>>, vector<2048x128xf32>
    %c0_1 = arith.constant 0 : index
    %c0_2 = arith.constant 0 : index
    %1 = vector.load %arg2[%c0_1, %c0_2] : memref<128x128xf32, #tpu.memory_space<vmem>>, vector<128x128xf32>
    %cst = arith.constant dense<0.000000e+00> : vector<2048x128xf32>
    %2 = tpu.matmul %0, %1, %cst {dimension_numbers = #tpu.dot_dimension_numbers<[1], [0], [0], [1], [0, 0, 1, 1], [], []>} : vector<2048x128xf32>, vector<128x128xf32>, vector<2048x128xf32> -> vector<2048x128xf32>
    %c0_3 = arith.constant 0 : index
    %c0_4 = arith.constant 0 : index
    %3 = vector.load %arg3[%c0_3, %c0_4] : memref<1x128xf32, #tpu.memory_space<vmem>>, vector<1x128xf32>
    %4 = vector.broadcast %3 : vector<1x128xf32> to vector<2048x128xf32>
    %5 = arith.addf %2, %4 : vector<2048x128xf32>
    %cst_5 = arith.constant 0.000000e+00 : f32
    %6 = vector.broadcast %cst_5 : f32 to vector<2048x128xf32>
    %7 = arith.maximumf %5, %6 : vector<2048x128xf32>
    %8 = vector.shape_cast %7 : vector<2048x128xf32> to vector<8x256x128xf32>
    %cst_6 = arith.constant dense<0.000000e+00> : vector<8x128xf32>
    %9 = vector.multi_reduction <add>, %8, %cst_6 [1] : vector<8x256x128xf32> to vector<8x128xf32>
    %cst_7 = arith.constant 3.906250e-03 : f32
    %10 = vector.broadcast %cst_7 : f32 to vector<8x128xf32>
    %11 = arith.mulf %9, %10 : vector<8x128xf32>
    %c0_8 = arith.constant 0 : index
    %c0_9 = arith.constant 0 : index
    %12 = vector.load %arg4[%c0_8, %c0_9] : memref<128x128xf32, #tpu.memory_space<vmem>>, vector<128x128xf32>
    %cst_10 = arith.constant dense<0.000000e+00> : vector<8x128xf32>
    %13 = tpu.matmul %11, %12, %cst_10 {dimension_numbers = #tpu.dot_dimension_numbers<[1], [0], [0], [1], [0, 0, 1, 1], [], []>} : vector<8x128xf32>, vector<128x128xf32>, vector<8x128xf32> -> vector<8x128xf32>
    %c0_11 = arith.constant 0 : index
    %c0_12 = arith.constant 0 : index
    %14 = vector.load %arg5[%c0_11, %c0_12] : memref<1x128xf32, #tpu.memory_space<vmem>>, vector<1x128xf32>
    %15 = vector.broadcast %14 : vector<1x128xf32> to vector<8x128xf32>
    %16 = arith.addf %13, %15 : vector<8x128xf32>
    %cst_13 = arith.constant dense<0xFF800000> : vector<8xf32>
    %17 = vector.multi_reduction <maximumf>, %16, %cst_13 [1] : vector<8x128xf32> to vector<8xf32>
    %18 = vector.shape_cast %17 : vector<8xf32> to vector<8x1xf32>
    %19 = vector.broadcast %18 : vector<8x1xf32> to vector<8x128xf32>
    %20 = arith.subf %16, %19 : vector<8x128xf32>
    %21 = math.exp %20 : vector<8x128xf32>
    %cst_14 = arith.constant dense<0.000000e+00> : vector<8xf32>
    %22 = vector.multi_reduction <add>, %21, %cst_14 [1] : vector<8x128xf32> to vector<8xf32>
    %23 = vector.shape_cast %22 : vector<8xf32> to vector<8x1xf32>
    %24 = vector.broadcast %23 : vector<8x1xf32> to vector<8x128xf32>
    %25 = arith.divf %21, %24 : vector<8x128xf32>
    %c0_15 = arith.constant 0 : index
    %c0_16 = arith.constant 0 : index
    %26 = vector.load %arg6[%c0_15, %c0_16] : memref<8x128xf32, #tpu.memory_space<vmem>>, vector<8x128xf32>
    tpu.vector_store %arg6[%c0_15, %c0_16], %25 {strides = array<i32>} : memref<8x128xf32, #tpu.memory_space<vmem>>, vector<8x128xf32>,
    return
  }
  func.func @transform_0(%arg0: i32) -> (i32, i32) {
    %c0_i32 = arith.constant 0 : i32
    %c0_i32_0 = arith.constant 0 : i32
    return %arg0, %c0_i32 : i32, i32
  }
  func.func @transform_1(%arg0: i32) -> (i32, i32) {
    %c0_i32 = arith.constant 0 : i32
    %c0_i32_0 = arith.constant 0 : i32
    %c0_i32_1 = arith.constant 0 : i32
    return %c0_i32, %c0_i32_0 : i32, i32
  }
  func.func @transform_2(%arg0: i32) -> (i32, i32) {
    %c0_i32 = arith.constant 0 : i32
    %c0_i32_0 = arith.constant 0 : i32
    %c0_i32_1 = arith.constant 0 : i32
    return %c0_i32, %c0_i32_0 : i32, i32
  }
  func.func @transform_3(%arg0: i32) -> (i32, i32) {
    %c0_i32 = arith.constant 0 : i32
    %c0_i32_0 = arith.constant 0 : i32
    %c0_i32_1 = arith.constant 0 : i32
    return %c0_i32, %c0_i32_0 : i32, i32
  }
  func.func @transform_4(%arg0: i32) -> (i32, i32) {
    %c0_i32 = arith.constant 0 : i32
    %c0_i32_0 = arith.constant 0 : i32
    %c0_i32_1 = arith.constant 0 : i32
    return %c0_i32, %c0_i32_0 : i32, i32
  }
  func.func @transform_5(%arg0: i32) -> (i32, i32) {
    %c0_i32 = arith.constant 0 : i32
    %c0_i32_0 = arith.constant 0 : i32
    return %arg0, %c0_i32 : i32, i32
  }
}

</mosaic_0001>

<bundles_post_ra>
// kernel: constraintmatch_forward.1
= control target key start
LH: loop header
LB: loop body
LE: loop exit
PB: predicated region body
PF: predicated region fallthrough
CT: control target
= control target key end

     0   :  { %s4502_s0 = inlined_call_operand.vmem [shape: f32[2048,128], index: 0, kind: input, shape index: {}]   ;;  %s4503_s1 = inlined_call_operand.vmem [shape: f32[128,128], index: 1, kind: input, shape index: {}]   ;;  %s4504_s2 = inlined_call_operand.vmem [shape: f32[1,128], index: 2, kind: input, shape index: {}]   ;;  %s4505_s3 = inlined_call_operand.vmem [shape: f32[128,128], index: 3, kind: input, shape index: {}]   ;;  %s4506_s4 = inlined_call_operand.vmem [shape: f32[1,128], index: 4, kind: input, shape index: {}]   ;;  %s4507_s5 = inlined_call_operand.hbm [shape: f32[8,128], index: 5, kind: output, shape index: {}]  }
   0x1   :  { %v277_v0 = vld [vmem:[%s4503_s1] sm:$0xff]  ;;  %v278_v1 = vld [vmem:[%s4503_s1 + $0x8] sm:$0xff]  ;;  %v279_v2 = vld [vmem:[%s4503_s1 + $0x10] sm:$0xff] }
   0x2   :  { %v3087_v3 = vpack.c.bf16 %v278_v1, %v277_v0  ;;  %v280_v4 = vld [vmem:[%s4503_s1 + $0x18] sm:$0xff]  ;;  %v281_v6 = vld [vmem:[%s4503_s1 + $0x20] sm:$0xff]  ;;  %v282_v7 = vld [vmem:[%s4503_s1 + $0x28] sm:$0xff] }
   0x3   :  { %v3091_v5 = vpack.c.bf16 %v280_v4, %v279_v2  ;;  %v3095_v8 = vpack.c.bf16 %v282_v7, %v281_v6  ;;  %v21_v9 = vld [vmem:[%s4502_s0] sm:$0xff]  ;;  %v283_v10 = vld [vmem:[%s4503_s1 + $0x30] sm:$0xff]  ;;  %v284_v11 = vld [vmem:[%s4503_s1 + $0x38] sm:$0xff] }
   0x4   :  { %3088 = vmatprep.subr.bf16.mxu0 %v3087_v3  ;;  %3143 = vmatprep.subr.bf16.mxu1 %v3087_v3  ;;  %v3099_v12 = vpack.c.bf16 %v284_v11, %v283_v10  ;;  %v285_v13 = vld [vmem:[%s4503_s1 + $0x40] sm:$0xff]  ;;  %v286_v14 = vld [vmem:[%s4503_s1 + $0x48] sm:$0xff]  ;;  %v287_v16 = vld [vmem:[%s4503_s1 + $0x50] sm:$0xff] }
   0x5   :  { %3090 = vmatpush3.bf16.msra.mxu0 %v3087_v3  ;;  %3151 = vmatpush3.bf16.msra.mxu1 %v3087_v3  ;;  %v3103_v15 = vpack.c.bf16 %v286_v14, %v285_v13  ;;  %v288_v17 = vld [vmem:[%s4503_s1 + $0x58] sm:$0xff]  ;;  %v151_v18 = vld [vmem:[%s4502_s0 + $0x410] sm:$0xff]  ;;  %v289_v20 = vld [vmem:[%s4503_s1 + $0x60] sm:$0xff] }
   0x6   :  { %3092 = vmatprep.subr.bf16.mxu0 %v3091_v5  ;;  %3144 = vmatprep.subr.bf16.mxu1 %v3091_v5  ;;  %v3107_v19 = vpack.c.bf16 %v288_v17, %v287_v16  ;;  %v290_v21 = vld [vmem:[%s4503_s1 + $0x68] sm:$0xff]  ;;  %v291_v23 = vld [vmem:[%s4503_s1 + $0x70] sm:$0xff]  ;;  %v292_v24 = vld [vmem:[%s4503_s1 + $0x78] sm:$0xff] }
   0x7   :  { %2668 = vmatprep.mubr.f32.mxu0 %v21_v9  ;;  %2863 = vmatprep.mubr.f32.mxu1 %v151_v18  ;;  %v3111_v22 = vpack.c.bf16 %v290_v21, %v289_v20  ;;  %v3115_v25 = vpack.c.bf16 %v292_v24, %v291_v23  ;;  %v22_v26 = vld [vmem:[%s4502_s0 + $0x8] sm:$0xff]  ;;  %v152_v27 = vld [vmem:[%s4502_s0 + $0x418] sm:$0xff]  ;;  %v23_v28 = vld [vmem:[%s4502_s0 + $0x10] sm:$0xff] }
   0x8   :  { %v153_v29 = vld [vmem:[%s4502_s0 + $0x420] sm:$0xff]  ;;  %v24_v30 = vld [vmem:[%s4502_s0 + $0x18] sm:$0xff]  ;;  %v154_v31 = vld [vmem:[%s4502_s0 + $0x428] sm:$0xff] }
   0x9   :  { %3094 = vmatpush3.bf16.msra.mxu0 %v3091_v5  ;;  %3152 = vmatpush3.bf16.msra.mxu1 %v3091_v5  ;;  %v25_v32 = vld [vmem:[%s4502_s0 + $0x20] sm:$0xff]  ;;  %v155_v33 = vld [vmem:[%s4502_s0 + $0x430] sm:$0xff]  ;;  %v26_v34 = vld [vmem:[%s4502_s0 + $0x28] sm:$0xff] }
   0xa   :  { %3096 = vmatprep.subr.bf16.mxu0 %v3095_v8  ;;  %3145 = vmatprep.subr.bf16.mxu1 %v3095_v8  ;;  %v156_v35 = vld [vmem:[%s4502_s0 + $0x438] sm:$0xff]  ;;  %v27_v36 = vld [vmem:[%s4502_s0 + $0x30] sm:$0xff]  ;;  %v157_v37 = vld [vmem:[%s4502_s0 + $0x440] sm:$0xff] }
   0xd   :  { %3098 = vmatpush3.bf16.msra.mxu0 %v3095_v8  ;;  %3153 = vmatpush3.bf16.msra.mxu1 %v3095_v8 }
   0xe   :  { %3100 = vmatprep.subr.bf16.mxu0 %v3099_v12  ;;  %3146 = vmatprep.subr.bf16.mxu1 %v3099_v12 }
  0x11   :  { %3102 = vmatpush3.bf16.msra.mxu0 %v3099_v12  ;;  %3154 = vmatpush3.bf16.msra.mxu1 %v3099_v12 }
  0x12   :  { %3104 = vmatprep.subr.bf16.mxu0 %v3103_v15  ;;  %3147 = vmatprep.subr.bf16.mxu1 %v3103_v15 }
  0x15   :  { %3106 = vmatpush3.bf16.msra.mxu0 %v3103_v15  ;;  %3155 = vmatpush3.bf16.msra.mxu1 %v3103_v15 }
  0x16   :  { %3108 = vmatprep.subr.bf16.mxu0 %v3107_v19  ;;  %3148 = vmatprep.subr.bf16.mxu1 %v3107_v19 }
  0x19   :  { %3110 = vmatpush3.bf16.msra.mxu0 %v3107_v19  ;;  %3156 = vmatpush3.bf16.msra.mxu1 %v3107_v19 }
  0x1a   :  { %3112 = vmatprep.subr.bf16.mxu0 %v3111_v22  ;;  %3149 = vmatprep.subr.bf16.mxu1 %v3111_v22 }
  0x1d   :  { %3114 = vmatpush3.bf16.msra.mxu0 %v3111_v22  ;;  %3157 = vmatpush3.bf16.msra.mxu1 %v3111_v22 }
  0x1e   :  { %3116 = vmatprep.subr.bf16.mxu0 %v3115_v25  ;;  %3150 = vmatprep.subr.bf16.mxu1 %v3115_v25 }
  0x21   :  { %3118 = vmatpush3.bf16.msra.mxu0 %v3115_v25  ;;  %3158 = vmatpush3.bf16.msra.mxu1 %v3115_v25 }
  0x24   :  { %2669 = vmatmul.mubr.f32.vlgmr.msra.gmra.mrb[0].mxu0 %v22_v26  ;;  %2864 = vmatmul.mubr.f32.vlgmr.msra.gmra.mrb[0].mxu1 %v152_v27 }
  0x25   :  { %2671 = vmatprep.mubr.f32.mxu0 %v23_v28  ;;  %2866 = vmatprep.mubr.f32.mxu1 %v153_v29 }
  0x28   :  { %2672 = vmatmul.mubr.f32.gmra.mrb[2].mxu0 %v24_v30  ;;  %2867 = vmatmul.mubr.f32.gmra.mrb[2].mxu1 %v154_v31 }
  0x29   :  { %2674 = vmatprep.mubr.f32.mxu0 %v25_v32  ;;  %2869 = vmatprep.mubr.f32.mxu1 %v155_v33 }
  0x2a   :  { %10 = vsyncpa [#allocation3], 0  ;;  %v28_v38 = vld [vmem:[%s4502_s0 + $0x38] sm:$0xff]  ;;  %v158_v39 = vld [vmem:[%s4502_s0 + $0x448] sm:$0xff]  ;;  %vm2236_vm0 = vcmask 1041409   ;;  %vm3194_vm1 = vmmov 0  }
  0x2b   :  { %v29_v40 = vld [vmem:[%s4502_s0 + $0x40] sm:$0xff]  ;;  %v159_v41 = vld [vmem:[%s4502_s0 + $0x450] sm:$0xff]  ;;  %v30_v42 = vld [vmem:[%s4502_s0 + $0x48] sm:$0xff]  ;;  %vm2238_vm2 = vcmask 1042434   ;;  %vm2240_vm3 = vcmask 1043459   ;;  %vm2242_vm4 = vcmask 1044484  }
  0x2c   :  { %2675 = vmatmul.mubr.f32.gmra.mrb[4].mxu0 %v26_v34  ;;  %2870 = vmatmul.mubr.f32.gmra.mrb[4].mxu1 %v156_v35  ;;  %v160_v43 = vld [vmem:[%s4502_s0 + $0x458] sm:$0xff]  ;;  %v31_v44 = vld [vmem:[%s4502_s0 + $0x50] sm:$0xff]  ;;  %v161_v45 = vld [vmem:[%s4502_s0 + $0x460] sm:$0xff]  ;;  %vm2244_vm5 = vcmask 1045509   ;;  %vm2246_vm6 = vcmask 1046534   ;;  %vm2248_vm7 = vcmask 1047559  }
  0x2d   :  { %2677 = vmatprep.mubr.f32.mxu0 %v27_v36  ;;  %2872 = vmatprep.mubr.f32.mxu1 %v157_v37  ;;  %v32_v46 = vld [vmem:[%s4502_s0 + $0x58] sm:$0xff]  ;;  %v162_v47 = vld [vmem:[%s4502_s0 + $0x468] sm:$0xff]  ;;  %v33_v48 = vld [vmem:[%s4502_s0 + $0x60] sm:$0xff]  ;;  %s3196_s28 = smov [#allocation2]  }
  0x2e   :  { %v163_v49 = vld [vmem:[%s4502_s0 + $0x470] sm:$0xff]  ;;  %v34_v50 = vld [vmem:[%s4502_s0 + $0x68] sm:$0xff]  ;;  %v164_v51 = vld [vmem:[%s4502_s0 + $0x478] sm:$0xff]  ;;  %s2337_s29 = sshll.u32 %s3196_s28, 4  ;;  %s2338_s29 = int_to_ptr.vmem [resolvable:$true] %s2337_s29 }
  0x2f   :  { %v35_v52 = vld [vmem:[%s4502_s0 + $0x70] sm:$0xff]  ;;  %v165_v53 = vld [vmem:[%s4502_s0 + $0x480] sm:$0xff]  ;;  %v36_v54 = vld [vmem:[%s4502_s0 + $0x78] sm:$0xff]  ;;  %s3169_s30 = scalar_lea.vmem %s2338_s29, 128  ;;  %p3174_p1 = scmp.lt.s32.totalorder %s2338_s29, %s2338_s29 }
  0x30   :  { %2678 = vmatmul.mubr.f32.gmra.mrb[6].mxu0 %v28_v38  ;;  %2873 = vmatmul.mubr.f32.gmra.mrb[6].mxu1 %v158_v39  ;;  %v166_v55 = vld [vmem:[%s4502_s0 + $0x488] sm:$0xff]  ;;  %v37_v56 = vld [vmem:[%s4502_s0 + $0x80] sm:$0xff]  ;;  %v167_v57 = vld [vmem:[%s4502_s0 + $0x490] sm:$0xff]  ;;  %p3170_p0 = scmp.ne.s32.totalorder %s2338_s29, %s3169_s30  ;;  %p3175_p2 = scmp.lt.s32.totalorder %s3169_s30, %s3169_s30 }
  0x31   :  { %2680 = vmatprep.mubr.f32.mxu0 %v29_v40  ;;  %2875 = vmatprep.mubr.f32.mxu1 %v159_v41  ;;  %v38_v58 = vld [vmem:[%s4502_s0 + $0x88] sm:$0xff]  ;;  %v168_v59 = vld [vmem:[%s4502_s0 + $0x498] sm:$0xff]  ;;  %v39_v60 = vld [vmem:[%s4502_s0 + $0x90] sm:$0xff] }
  0x32   :  { %v169_v61 = vld [vmem:[%s4502_s0 + $0x4a0] sm:$0xff]  ;;  %v40_v62 = vld [vmem:[%s4502_s0 + $0x98] sm:$0xff]  ;;  %v170_v63 = vld [vmem:[%s4502_s0 + $0x4a8] sm:$0xff]  ;;  %p3176_p3 = por %p3175_p2, %p3174_p1 }
  0x33   :  { %v41_v0 = vld [vmem:[%s4502_s0 + $0xa0] sm:$0xff]  ;;  %v171_v1 = vld [vmem:[%s4502_s0 + $0x4b0] sm:$0xff]  ;;  %v42_v2 = vld [vmem:[%s4502_s0 + $0xa8] sm:$0xff] }
  0x34   :  { %2681 = vmatmul.mubr.f32.gmra.mrb[8].mxu0 %v30_v42  ;;  %2876 = vmatmul.mubr.f32.gmra.mrb[8].mxu1 %v160_v43  ;;  %v172_v3 = vld [vmem:[%s4502_s0 + $0x4b8] sm:$0xff]  ;;  %v43_v4 = vld [vmem:[%s4502_s0 + $0xb0] sm:$0xff]  ;;  %v173_v5 = vld [vmem:[%s4502_s0 + $0x4c0] sm:$0xff]  ;;  %p3177_p4 = pnand %p3176_p3, %p3170_p0 }
  0x35   :  { %2683 = vmatprep.mubr.f32.mxu0 %v31_v44  ;;  %2878 = vmatprep.mubr.f32.mxu1 %v161_v45  ;;  %v44_v6 = vld [vmem:[%s4502_s0 + $0xb8] sm:$0xff]  ;;  %v174_v7 = vld [vmem:[%s4502_s0 + $0x4c8] sm:$0xff]  ;;  %v45_v8 = vld [vmem:[%s4502_s0 + $0xc0] sm:$0xff] }
  0x36   :  { %v175_v9 = vld [vmem:[%s4502_s0 + $0x4d0] sm:$0xff]  ;;  %v46_v10 = vld [vmem:[%s4502_s0 + $0xc8] sm:$0xff]  ;;  %v176_v11 = vld [vmem:[%s4502_s0 + $0x4d8] sm:$0xff] }
  0x37   :  { %v47_v12 = vld [vmem:[%s4502_s0 + $0xd0] sm:$0xff]  ;;  %v177_v13 = vld [vmem:[%s4502_s0 + $0x4e0] sm:$0xff]  ;;  %v48_v14 = vld [vmem:[%s4502_s0 + $0xd8] sm:$0xff] }
  0x38   :  { %2684 = vmatmul.mubr.f32.gmra.mrb[10].mxu0 %v32_v46  ;;  %2879 = vmatmul.mubr.f32.gmra.mrb[10].mxu1 %v162_v47  ;;  %v178_v15 = vld [vmem:[%s4502_s0 + $0x4e8] sm:$0xff]  ;;  %v49_v16 = vld [vmem:[%s4502_s0 + $0xe0] sm:$0xff]  ;;  %v179_v17 = vld [vmem:[%s4502_s0 + $0x4f0] sm:$0xff] }
  0x39   :  { %2686 = vmatprep.mubr.f32.mxu0 %v33_v48  ;;  %2881 = vmatprep.mubr.f32.mxu1 %v163_v49  ;;  %v50_v18 = vld [vmem:[%s4502_s0 + $0xe8] sm:$0xff]  ;;  %v180_v19 = vld [vmem:[%s4502_s0 + $0x4f8] sm:$0xff]  ;;  %v51_v20 = vld [vmem:[%s4502_s0 + $0xf0] sm:$0xff] }
  0x3a   :  { %v181_v21 = vld [vmem:[%s4502_s0 + $0x500] sm:$0xff]  ;;  %v52_v22 = vld [vmem:[%s4502_s0 + $0xf8] sm:$0xff]  ;;  %v182_v23 = vld [vmem:[%s4502_s0 + $0x508] sm:$0xff] }
  0x3b   :  { %v53_v24 = vld [vmem:[%s4502_s0 + $0x100] sm:$0xff]  ;;  %v183_v25 = vld [vmem:[%s4502_s0 + $0x510] sm:$0xff]  ;;  %v54_v26 = vld [vmem:[%s4502_s0 + $0x108] sm:$0xff] }
  0x3c   :  { %2687 = vmatmul.mubr.f32.gmra.mrb[12].mxu0 %v34_v50  ;;  %2882 = vmatmul.mubr.f32.gmra.mrb[12].mxu1 %v164_v51  ;;  %v184_v27 = vld [vmem:[%s4502_s0 + $0x518] sm:$0xff]  ;;  %v55_v28 = vld [vmem:[%s4502_s0 + $0x110] sm:$0xff]  ;;  %v185_v29 = vld [vmem:[%s4502_s0 + $0x520] sm:$0xff] }
  0x3d   :  { %2689 = vmatprep.mubr.f32.mxu0 %v35_v52  ;;  %2884 = vmatprep.mubr.f32.mxu1 %v165_v53  ;;  %v56_v30 = vld [vmem:[%s4502_s0 + $0x118] sm:$0xff]  ;;  %v186_v31 = vld [vmem:[%s4502_s0 + $0x528] sm:$0xff]  ;;  %v57_v32 = vld [vmem:[%s4502_s0 + $0x120] sm:$0xff] }
  0x3e   :  { %v187_v33 = vld [vmem:[%s4502_s0 + $0x530] sm:$0xff]  ;;  %v58_v34 = vld [vmem:[%s4502_s0 + $0x128] sm:$0xff]  ;;  %v188_v35 = vld [vmem:[%s4502_s0 + $0x538] sm:$0xff] }
  0x3f   :  { %v59_v36 = vld [vmem:[%s4502_s0 + $0x130] sm:$0xff]  ;;  %v189_v37 = vld [vmem:[%s4502_s0 + $0x540] sm:$0xff]  ;;  %v60_v38 = vld [vmem:[%s4502_s0 + $0x138] sm:$0xff] }
  0x40   :  { %2690 = vmatmul.mubr.f32.gmra.mrb[14].mxu0 %v36_v54  ;;  %2885 = vmatmul.mubr.f32.gmra.mrb[14].mxu1 %v166_v55  ;;  %v190_v39 = vld [vmem:[%s4502_s0 + $0x548] sm:$0xff]  ;;  %v61_v40 = vld [vmem:[%s4502_s0 + $0x140] sm:$0xff]  ;;  %v191_v41 = vld [vmem:[%s4502_s0 + $0x550] sm:$0xff] }
  0x41   :  { %2692 = vmatprep.mubr.f32.mxu0 %v37_v56  ;;  %2887 = vmatprep.mubr.f32.mxu1 %v167_v57  ;;  %v62_v42 = vld [vmem:[%s4502_s0 + $0x148] sm:$0xff]  ;;  %v192_v43 = vld [vmem:[%s4502_s0 + $0x558] sm:$0xff]  ;;  %v63_v44 = vld [vmem:[%s4502_s0 + $0x150] sm:$0xff] }
  0x42   :  { %v193_v45 = vld [vmem:[%s4502_s0 + $0x560] sm:$0xff]  ;;  %v64_v46 = vld [vmem:[%s4502_s0 + $0x158] sm:$0xff]  ;;  %v194_v47 = vld [vmem:[%s4502_s0 + $0x568] sm:$0xff] }
  0x43   :  { %v65_v48 = vld [vmem:[%s4502_s0 + $0x160] sm:$0xff]  ;;  %v195_v49 = vld [vmem:[%s4502_s0 + $0x570] sm:$0xff]  ;;  %v66_v50 = vld [vmem:[%s4502_s0 + $0x168] sm:$0xff] }
  0x44   :  { %2693 = vmatmul.mubr.f32.gmra.mrb[16].mxu0 %v38_v58  ;;  %2888 = vmatmul.mubr.f32.gmra.mrb[16].mxu1 %v168_v59  ;;  %v196_v51 = vld [vmem:[%s4502_s0 + $0x578] sm:$0xff]  ;;  %v67_v52 = vld [vmem:[%s4502_s0 + $0x170] sm:$0xff]  ;;  %v197_v53 = vld [vmem:[%s4502_s0 + $0x580] sm:$0xff] }
  0x45   :  { %2695 = vmatprep.mubr.f32.mxu0 %v39_v60  ;;  %2890 = vmatprep.mubr.f32.mxu1 %v169_v61  ;;  %v68_v54 = vld [vmem:[%s4502_s0 + $0x178] sm:$0xff]  ;;  %v198_v55 = vld [vmem:[%s4502_s0 + $0x588] sm:$0xff]  ;;  %v69_v56 = vld [vmem:[%s4502_s0 + $0x180] sm:$0xff] }
  0x46   :  { %v199_v57 = vld [vmem:[%s4502_s0 + $0x590] sm:$0xff]  ;;  %v70_v58 = vld [vmem:[%s4502_s0 + $0x188] sm:$0xff]  ;;  %v200_v59 = vld [vmem:[%s4502_s0 + $0x598] sm:$0xff] }
  0x47   :  { %v71_v60 = vld [vmem:[%s4502_s0 + $0x190] sm:$0xff]  ;;  %v201_v61 = vld [vmem:[%s4502_s0 + $0x5a0] sm:$0xff] }
  0x48   :  { %2696 = vmatmul.mubr.f32.gmra.mrb[18].mxu0 %v40_v62  ;;  %2891 = vmatmul.mubr.f32.gmra.mrb[18].mxu1 %v170_v63  ;;  %v72_v62 = vld [vmem:[%s4502_s0 + $0x198] sm:$0xff]  ;;  %v202_v63 = vld [vmem:[%s4502_s0 + $0x5a8] sm:$0xff] }
  0x49   :  { %2698 = vmatprep.mubr.f32.mxu0 %v41_v0  ;;  %2893 = vmatprep.mubr.f32.mxu1 %v171_v1  ;;  %v73_v0 = vld [vmem:[%s4502_s0 + $0x1a0] sm:$0xff]  ;;  %v203_v1 = vld [vmem:[%s4502_s0 + $0x5b0] sm:$0xff] }
  0x4c   :  { %2699 = vmatmul.mubr.f32.gmra.mrb[20].mxu0 %v42_v2  ;;  %2894 = vmatmul.mubr.f32.gmra.mrb[20].mxu1 %v172_v3  ;;  %v74_v2 = vld [vmem:[%s4502_s0 + $0x1a8] sm:$0xff]  ;;  %v204_v3 = vld [vmem:[%s4502_s0 + $0x5b8] sm:$0xff] }
  0x4d   :  { %2701 = vmatprep.mubr.f32.mxu0 %v43_v4  ;;  %2896 = vmatprep.mubr.f32.mxu1 %v173_v5  ;;  %v75_v4 = vld [vmem:[%s4502_s0 + $0x1b0] sm:$0xff]  ;;  %v205_v5 = vld [vmem:[%s4502_s0 + $0x5c0] sm:$0xff] }
  0x50   :  { %2702 = vmatmul.mubr.f32.gmra.mrb[22].mxu0 %v44_v6  ;;  %2897 = vmatmul.mubr.f32.gmra.mrb[22].mxu1 %v174_v7  ;;  %v76_v6 = vld [vmem:[%s4502_s0 + $0x1b8] sm:$0xff]  ;;  %v206_v7 = vld [vmem:[%s4502_s0 + $0x5c8] sm:$0xff] }
  0x51   :  { %2704 = vmatprep.mubr.f32.mxu0 %v45_v8  ;;  %2899 = vmatprep.mubr.f32.mxu1 %v175_v9  ;;  %v77_v8 = vld [vmem:[%s4502_s0 + $0x1c0] sm:$0xff]  ;;  %v207_v9 = vld [vmem:[%s4502_s0 + $0x5d0] sm:$0xff] }
  0x54   :  { %2705 = vmatmul.mubr.f32.gmra.mrb[24].mxu0 %v46_v10  ;;  %2900 = vmatmul.mubr.f32.gmra.mrb[24].mxu1 %v176_v11  ;;  %v78_v10 = vld [vmem:[%s4502_s0 + $0x1c8] sm:$0xff]  ;;  %v208_v11 = vld [vmem:[%s4502_s0 + $0x5d8] sm:$0xff] }
  0x55   :  { %2707 = vmatprep.mubr.f32.mxu0 %v47_v12  ;;  %2902 = vmatprep.mubr.f32.mxu1 %v177_v13  ;;  %v79_v12 = vld [vmem:[%s4502_s0 + $0x1d0] sm:$0xff]  ;;  %v209_v13 = vld [vmem:[%s4502_s0 + $0x5e0] sm:$0xff] }
  0x58   :  { %2708 = vmatmul.mubr.f32.gmra.mrb[26].mxu0 %v48_v14  ;;  %2903 = vmatmul.mubr.f32.gmra.mrb[26].mxu1 %v178_v15  ;;  %v80_v14 = vld [vmem:[%s4502_s0 + $0x1d8] sm:$0xff]  ;;  %v210_v15 = vld [vmem:[%s4502_s0 + $0x5e8] sm:$0xff] }
  0x59   :  { %2710 = vmatprep.mubr.f32.mxu0 %v49_v16  ;;  %2905 = vmatprep.mubr.f32.mxu1 %v179_v17  ;;  %v81_v16 = vld [vmem:[%s4502_s0 + $0x1e0] sm:$0xff]  ;;  %v211_v17 = vld [vmem:[%s4502_s0 + $0x5f0] sm:$0xff] }
  0x5c   :  { %2711 = vmatmul.mubr.f32.gmra.mrb[28].mxu0 %v50_v18  ;;  %2906 = vmatmul.mubr.f32.gmra.mrb[28].mxu1 %v180_v19  ;;  %v82_v18 = vld [vmem:[%s4502_s0 + $0x1e8] sm:$0xff]  ;;  %v212_v19 = vld [vmem:[%s4502_s0 + $0x5f8] sm:$0xff] }
  0x5d   :  { %2713 = vmatprep.mubr.f32.mxu0 %v51_v20  ;;  %2908 = vmatprep.mubr.f32.mxu1 %v181_v21  ;;  %v83_v20 = vld [vmem:[%s4502_s0 + $0x1f0] sm:$0xff]  ;;  %v213_v21 = vld [vmem:[%s4502_s0 + $0x600] sm:$0xff] }
  0x60   :  { %2714 = vmatmul.mubr.f32.gmra.mrb[30].mxu0 %v52_v22  ;;  %2909 = vmatmul.mubr.f32.gmra.mrb[30].mxu1 %v182_v23  ;;  %v84_v22 = vld [vmem:[%s4502_s0 + $0x1f8] sm:$0xff]  ;;  %v214_v23 = vld [vmem:[%s4502_s0 + $0x608] sm:$0xff] }
  0x61   :  { %2716 = vmatprep.mubr.f32.mxu0 %v53_v24  ;;  %2911 = vmatprep.mubr.f32.mxu1 %v183_v25  ;;  %v85_v24 = vld [vmem:[%s4502_s0 + $0x200] sm:$0xff]  ;;  %v215_v25 = vld [vmem:[%s4502_s0 + $0x610] sm:$0xff] }
  0x64   :  { %2717 = vmatmul.mubr.f32.gmra.mrb[32].mxu0 %v54_v26  ;;  %2912 = vmatmul.mubr.f32.gmra.mrb[32].mxu1 %v184_v27  ;;  %v86_v26 = vld [vmem:[%s4502_s0 + $0x208] sm:$0xff]  ;;  %v216_v27 = vld [vmem:[%s4502_s0 + $0x618] sm:$0xff] }
  0x65   :  { %2719 = vmatprep.mubr.f32.mxu0 %v55_v28  ;;  %2914 = vmatprep.mubr.f32.mxu1 %v185_v29  ;;  %v87_v28 = vld [vmem:[%s4502_s0 + $0x210] sm:$0xff]  ;;  %v217_v29 = vld [vmem:[%s4502_s0 + $0x620] sm:$0xff] }
  0x68   :  { %2720 = vmatmul.mubr.f32.gmra.mrb[34].mxu0 %v56_v30  ;;  %2915 = vmatmul.mubr.f32.gmra.mrb[34].mxu1 %v186_v31  ;;  %v88_v30 = vld [vmem:[%s4502_s0 + $0x218] sm:$0xff]  ;;  %v218_v31 = vld [vmem:[%s4502_s0 + $0x628] sm:$0xff] }
  0x69   :  { %2722 = vmatprep.mubr.f32.mxu0 %v57_v32  ;;  %2917 = vmatprep.mubr.f32.mxu1 %v187_v33  ;;  %v89_v32 = vld [vmem:[%s4502_s0 + $0x220] sm:$0xff]  ;;  %v219_v33 = vld [vmem:[%s4502_s0 + $0x630] sm:$0xff] }
  0x6c   :  { %2723 = vmatmul.mubr.f32.gmra.mrb[36].mxu0 %v58_v34  ;;  %2918 = vmatmul.mubr.f32.gmra.mrb[36].mxu1 %v188_v35  ;;  %v90_v34 = vld [vmem:[%s4502_s0 + $0x228] sm:$0xff]  ;;  %v220_v35 = vld [vmem:[%s4502_s0 + $0x638] sm:$0xff] }
  0x6d   :  { %2725 = vmatprep.mubr.f32.mxu0 %v59_v36  ;;  %2920 = vmatprep.mubr.f32.mxu1 %v189_v37  ;;  %v91_v36 = vld [vmem:[%s4502_s0 + $0x230] sm:$0xff]  ;;  %v221_v37 = vld [vmem:[%s4502_s0 + $0x640] sm:$0xff] }
  0x70   :  { %2726 = vmatmul.mubr.f32.gmra.mrb[38].mxu0 %v60_v38  ;;  %2921 = vmatmul.mubr.f32.gmra.mrb[38].mxu1 %v190_v39  ;;  %v92_v38 = vld [vmem:[%s4502_s0 + $0x238] sm:$0xff]  ;;  %v222_v39 = vld [vmem:[%s4502_s0 + $0x648] sm:$0xff] }
  0x71   :  { %2728 = vmatprep.mubr.f32.mxu0 %v61_v40  ;;  %2923 = vmatprep.mubr.f32.mxu1 %v191_v41  ;;  %v93_v40 = vld [vmem:[%s4502_s0 + $0x240] sm:$0xff]  ;;  %v223_v41 = vld [vmem:[%s4502_s0 + $0x650] sm:$0xff] }
  0x74   :  { %2729 = vmatmul.mubr.f32.gmra.mrb[40].mxu0 %v62_v42  ;;  %2924 = vmatmul.mubr.f32.gmra.mrb[40].mxu1 %v192_v43  ;;  %v94_v42 = vld [vmem:[%s4502_s0 + $0x248] sm:$0xff]  ;;  %v224_v43 = vld [vmem:[%s4502_s0 + $0x658] sm:$0xff] }
  0x75   :  { %2731 = vmatprep.mubr.f32.mxu0 %v63_v44  ;;  %2926 = vmatprep.mubr.f32.mxu1 %v193_v45  ;;  %v95_v44 = vld [vmem:[%s4502_s0 + $0x250] sm:$0xff]  ;;  %v225_v45 = vld [vmem:[%s4502_s0 + $0x660] sm:$0xff] }
  0x78   :  { %2732 = vmatmul.mubr.f32.gmra.mrb[42].mxu0 %v64_v46  ;;  %2927 = vmatmul.mubr.f32.gmra.mrb[42].mxu1 %v194_v47  ;;  %v96_v46 = vld [vmem:[%s4502_s0 + $0x258] sm:$0xff]  ;;  %v226_v47 = vld [vmem:[%s4502_s0 + $0x668] sm:$0xff] }
  0x79   :  { %2734 = vmatprep.mubr.f32.mxu0 %v65_v48  ;;  %2929 = vmatprep.mubr.f32.mxu1 %v195_v49  ;;  %v97_v48 = vld [vmem:[%s4502_s0 + $0x260] sm:$0xff]  ;;  %v227_v49 = vld [vmem:[%s4502_s0 + $0x670] sm:$0xff] }
  0x7c   :  { %2735 = vmatmul.mubr.f32.gmra.mrb[44].mxu0 %v66_v50  ;;  %2930 = vmatmul.mubr.f32.gmra.mrb[44].mxu1 %v196_v51  ;;  %v98_v50 = vld [vmem:[%s4502_s0 + $0x268] sm:$0xff]  ;;  %v228_v51 = vld [vmem:[%s4502_s0 + $0x678] sm:$0xff] }
  0x7d   :  { %2737 = vmatprep.mubr.f32.mxu0 %v67_v52  ;;  %2932 = vmatprep.mubr.f32.mxu1 %v197_v53  ;;  %v99_v52 = vld [vmem:[%s4502_s0 + $0x270] sm:$0xff]  ;;  %v229_v53 = vld [vmem:[%s4502_s0 + $0x680] sm:$0xff] }
  0x80   :  { %2738 = vmatmul.mubr.f32.gmra.mrb[46].mxu0 %v68_v54  ;;  %2933 = vmatmul.mubr.f32.gmra.mrb[46].mxu1 %v198_v55  ;;  %v100_v54 = vld [vmem:[%s4502_s0 + $0x278] sm:$0xff]  ;;  %v230_v55 = vld [vmem:[%s4502_s0 + $0x688] sm:$0xff] }
  0x81   :  { %2740 = vmatprep.mubr.f32.mxu0 %v69_v56  ;;  %2935 = vmatprep.mubr.f32.mxu1 %v199_v57  ;;  %v101_v56 = vld [vmem:[%s4502_s0 + $0x280] sm:$0xff]  ;;  %v231_v57 = vld [vmem:[%s4502_s0 + $0x690] sm:$0xff] }
  0x84   :  { %2741 = vmatmul.mubr.f32.gmra.mrb[48].mxu0 %v70_v58  ;;  %2936 = vmatmul.mubr.f32.gmra.mrb[48].mxu1 %v200_v59  ;;  %v102_v58 = vld [vmem:[%s4502_s0 + $0x288] sm:$0xff]  ;;  %v232_v59 = vld [vmem:[%s4502_s0 + $0x698] sm:$0xff] }
  0x85   :  { %2743 = vmatprep.mubr.f32.mxu0 %v71_v60  ;;  %2938 = vmatprep.mubr.f32.mxu1 %v201_v61  ;;  %v103_v60 = vld [vmem:[%s4502_s0 + $0x290] sm:$0xff]  ;;  %v233_v61 = vld [vmem:[%s4502_s0 + $0x6a0] sm:$0xff] }
  0x88   :  { %2744 = vmatmul.mubr.f32.gmra.mrb[50].mxu0 %v72_v62  ;;  %2939 = vmatmul.mubr.f32.gmra.mrb[50].mxu1 %v202_v63  ;;  %v104_v62 = vld [vmem:[%s4502_s0 + $0x298] sm:$0xff]  ;;  %v234_v63 = vld [vmem:[%s4502_s0 + $0x6a8] sm:$0xff] }
  0x89   :  { %2746 = vmatprep.mubr.f32.mxu0 %v73_v0  ;;  %2941 = vmatprep.mubr.f32.mxu1 %v203_v1  ;;  %v105_v0 = vld [vmem:[%s4502_s0 + $0x2a0] sm:$0xff]  ;;  %v235_v1 = vld [vmem:[%s4502_s0 + $0x6b0] sm:$0xff] }
  0x8c   :  { %2747 = vmatmul.mubr.f32.gmra.mrb[52].mxu0 %v74_v2  ;;  %2942 = vmatmul.mubr.f32.gmra.mrb[52].mxu1 %v204_v3  ;;  %v106_v2 = vld [vmem:[%s4502_s0 + $0x2a8] sm:$0xff]  ;;  %v236_v3 = vld [vmem:[%s4502_s0 + $0x6b8] sm:$0xff] }
  0x8d   :  { %2749 = vmatprep.mubr.f32.mxu0 %v75_v4  ;;  %2944 = vmatprep.mubr.f32.mxu1 %v205_v5  ;;  %v107_v4 = vld [vmem:[%s4502_s0 + $0x2b0] sm:$0xff]  ;;  %v237_v5 = vld [vmem:[%s4502_s0 + $0x6c0] sm:$0xff] }
  0x90   :  { %2750 = vmatmul.mubr.f32.gmra.mrb[54].mxu0 %v76_v6  ;;  %2945 = vmatmul.mubr.f32.gmra.mrb[54].mxu1 %v206_v7  ;;  %v108_v6 = vld [vmem:[%s4502_s0 + $0x2b8] sm:$0xff]  ;;  %v238_v7 = vld [vmem:[%s4502_s0 + $0x6c8] sm:$0xff] }
  0x91   :  { %2752 = vmatprep.mubr.f32.mxu0 %v77_v8  ;;  %2947 = vmatprep.mubr.f32.mxu1 %v207_v9  ;;  %v109_v8 = vld [vmem:[%s4502_s0 + $0x2c0] sm:$0xff]  ;;  %v239_v9 = vld [vmem:[%s4502_s0 + $0x6d0] sm:$0xff] }
  0x94   :  { %2753 = vmatmul.mubr.f32.gmra.mrb[56].mxu0 %v78_v10  ;;  %2948 = vmatmul.mubr.f32.gmra.mrb[56].mxu1 %v208_v11  ;;  %v110_v10 = vld [vmem:[%s4502_s0 + $0x2c8] sm:$0xff]  ;;  %v240_v11 = vld [vmem:[%s4502_s0 + $0x6d8] sm:$0xff] }
  0x95   :  { %2755 = vmatprep.mubr.f32.mxu0 %v79_v12  ;;  %2950 = vmatprep.mubr.f32.mxu1 %v209_v13  ;;  %v111_v12 = vld [vmem:[%s4502_s0 + $0x2d0] sm:$0xff]  ;;  %v241_v13 = vld [vmem:[%s4502_s0 + $0x6e0] sm:$0xff] }
  0x98   :  { %2756 = vmatmul.mubr.f32.gmra.mrb[58].mxu0 %v80_v14  ;;  %2951 = vmatmul.mubr.f32.gmra.mrb[58].mxu1 %v210_v15  ;;  %v112_v14 = vld [vmem:[%s4502_s0 + $0x2d8] sm:$0xff]  ;;  %v242_v15 = vld [vmem:[%s4502_s0 + $0x6e8] sm:$0xff] }
  0x99   :  { %2758 = vmatprep.mubr.f32.mxu0 %v81_v16  ;;  %2953 = vmatprep.mubr.f32.mxu1 %v211_v17  ;;  %v2205_v16 = vld [vmem:[%s4505_s3] sm:$0xff]  ;;  %v2206_v17 = vld [vmem:[%s4505_s3 + $0x8] sm:$0xff] }
  0x9c   :  { %2759 = vmatmul.mubr.f32.gmra.mrb[60].mxu0 %v82_v18  ;;  %2954 = vmatmul.mubr.f32.gmra.mrb[60].mxu1 %v212_v19  ;;  %v113_v18 = vld [vmem:[%s4502_s0 + $0x2e0] sm:$0xff]  ;;  %v243_v19 = vld [vmem:[%s4502_s0 + $0x6f0] sm:$0xff] }
  0x9d   :  { %2761 = vmatprep.mubr.f32.mxu0 %v83_v20  ;;  %2956 = vmatprep.mubr.f32.mxu1 %v213_v21  ;;  %v3193_v20 = vmov 0.0|0.0   ;;  %v3120_v21 = vpack.c.bf16 %v2206_v17, %v2205_v16  ;;  %v263_v16 = vld [vmem:[%s4502_s0 + $0x790] sm:$0xff] }
  0x9e   :  { %3119 = vmatprep.subr.bf16.mxu1 %v3193_v20 }
  0x9f   :  { %3121 = vmatpush3.bf16.msra.mxu1 %v3120_v21 }
  0xa0   :  { %2762 = vmatmul.mubr.f32.gmra.mrb[62].mxu0 %v84_v22  ;;  %2957 = vmatmul.mubr.f32.gmra.mrb[62].mxu1 %v214_v23  ;;  %v114_v22 = vld [vmem:[%s4502_s0 + $0x2e8] sm:$0xff]  ;;  %v244_v23 = vld [vmem:[%s4502_s0 + $0x6f8] sm:$0xff] }
  0xa1   :  { %2764 = vmatprep.mubr.f32.mxu0 %v85_v24  ;;  %2959 = vmatprep.mubr.f32.mxu1 %v215_v25  ;;  %v115_v24 = vld [vmem:[%s4502_s0 + $0x2f0] sm:$0xff]  ;;  %v245_v25 = vld [vmem:[%s4502_s0 + $0x700] sm:$0xff] }
  0xa2   :  { %3122 = vmatprep.subr.bf16.mxu1 %v3193_v20 }
  0xa4   :  { %2765 = vmatmul.mubr.f32.gmra.mrb[64].mxu0 %v86_v26  ;;  %2960 = vmatmul.mubr.f32.gmra.mrb[64].mxu1 %v216_v27  ;;  %v116_v26 = vld [vmem:[%s4502_s0 + $0x2f8] sm:$0xff]  ;;  %v246_v27 = vld [vmem:[%s4502_s0 + $0x708] sm:$0xff] }
  0xa5   :  { %2767 = vmatprep.mubr.f32.mxu0 %v87_v28  ;;  %2962 = vmatprep.mubr.f32.mxu1 %v217_v29  ;;  %v117_v28 = vld [vmem:[%s4502_s0 + $0x300] sm:$0xff]  ;;  %v247_v29 = vld [vmem:[%s4502_s0 + $0x710] sm:$0xff] }
  0xa8   :  { %2768 = vmatmul.mubr.f32.gmra.mrb[66].mxu0 %v88_v30  ;;  %2963 = vmatmul.mubr.f32.gmra.mrb[66].mxu1 %v218_v31  ;;  %v118_v30 = vld [vmem:[%s4502_s0 + $0x308] sm:$0xff]  ;;  %v248_v31 = vld [vmem:[%s4502_s0 + $0x718] sm:$0xff] }
  0xa9   :  { %2770 = vmatprep.mubr.f32.mxu0 %v89_v32  ;;  %2965 = vmatprep.mubr.f32.mxu1 %v219_v33  ;;  %v119_v32 = vld [vmem:[%s4502_s0 + $0x310] sm:$0xff]  ;;  %v249_v33 = vld [vmem:[%s4502_s0 + $0x720] sm:$0xff] }
  0xac   :  { %2771 = vmatmul.mubr.f32.gmra.mrb[68].mxu0 %v90_v34  ;;  %2966 = vmatmul.mubr.f32.gmra.mrb[68].mxu1 %v220_v35  ;;  %v120_v34 = vld [vmem:[%s4502_s0 + $0x318] sm:$0xff]  ;;  %v250_v35 = vld [vmem:[%s4502_s0 + $0x728] sm:$0xff] }
  0xad   :  { %2773 = vmatprep.mubr.f32.mxu0 %v91_v36  ;;  %2968 = vmatprep.mubr.f32.mxu1 %v221_v37  ;;  %v121_v36 = vld [vmem:[%s4502_s0 + $0x320] sm:$0xff]  ;;  %v251_v37 = vld [vmem:[%s4502_s0 + $0x730] sm:$0xff] }
  0xb0   :  { %2774 = vmatmul.mubr.f32.gmra.mrb[70].mxu0 %v92_v38  ;;  %2969 = vmatmul.mubr.f32.gmra.mrb[70].mxu1 %v222_v39  ;;  %v122_v38 = vld [vmem:[%s4502_s0 + $0x328] sm:$0xff]  ;;  %v252_v39 = vld [vmem:[%s4502_s0 + $0x738] sm:$0xff] }
  0xb1   :  { %2776 = vmatprep.mubr.f32.mxu0 %v93_v40  ;;  %2971 = vmatprep.mubr.f32.mxu1 %v223_v41  ;;  %v123_v40 = vld [vmem:[%s4502_s0 + $0x330] sm:$0xff]  ;;  %v253_v41 = vld [vmem:[%s4502_s0 + $0x740] sm:$0xff] }
  0xb4   :  { %2777 = vmatmul.mubr.f32.gmra.mrb[72].mxu0 %v94_v42  ;;  %2972 = vmatmul.mubr.f32.gmra.mrb[72].mxu1 %v224_v43  ;;  %v124_v42 = vld [vmem:[%s4502_s0 + $0x338] sm:$0xff]  ;;  %v254_v43 = vld [vmem:[%s4502_s0 + $0x748] sm:$0xff] }
  0xb5   :  { %2779 = vmatprep.mubr.f32.mxu0 %v95_v44  ;;  %2974 = vmatprep.mubr.f32.mxu1 %v225_v45  ;;  %v125_v44 = vld [vmem:[%s4502_s0 + $0x340] sm:$0xff]  ;;  %v255_v45 = vld [vmem:[%s4502_s0 + $0x750] sm:$0xff] }
  0xb8   :  { %2780 = vmatmul.mubr.f32.gmra.mrb[74].mxu0 %v96_v46  ;;  %2975 = vmatmul.mubr.f32.gmra.mrb[74].mxu1 %v226_v47  ;;  %v126_v46 = vld [vmem:[%s4502_s0 + $0x348] sm:$0xff]  ;;  %v256_v47 = vld [vmem:[%s4502_s0 + $0x758] sm:$0xff] }
  0xb9   :  { %2782 = vmatprep.mubr.f32.mxu0 %v97_v48  ;;  %2977 = vmatprep.mubr.f32.mxu1 %v227_v49  ;;  %v127_v48 = vld [vmem:[%s4502_s0 + $0x350] sm:$0xff]  ;;  %v257_v49 = vld [vmem:[%s4502_s0 + $0x760] sm:$0xff] }
  0xbc   :  { %2783 = vmatmul.mubr.f32.gmra.mrb[76].mxu0 %v98_v50  ;;  %2978 = vmatmul.mubr.f32.gmra.mrb[76].mxu1 %v228_v51  ;;  %v3928_v50 = vld [vmem:[%s4504_s2] ss:$0 sm:$0xff]  ;;  %v128_v51 = vld [vmem:[%s4502_s0 + $0x358] sm:$0xff] }
  0xbd   :  { %2785 = vmatprep.mubr.f32.mxu0 %v99_v52  ;;  %2980 = vmatprep.mubr.f32.mxu1 %v229_v53  ;;  %v258_v52 = vld [vmem:[%s4502_s0 + $0x768] sm:$0xff]  ;;  %v2207_v53 = vld [vmem:[%s4505_s3 + $0x10] sm:$0xff] }
  0xc0   :  { %2786 = vmatmul.mubr.f32.gmra.mrb[78].mxu0 %v100_v54  ;;  %2981 = vmatmul.mubr.f32.gmra.mrb[78].mxu1 %v230_v55  ;;  %v2208_v54 = vld [vmem:[%s4505_s3 + $0x18] sm:$0xff]  ;;  %v129_v55 = vld [vmem:[%s4502_s0 + $0x360] sm:$0xff] }
  0xc1   :  { %2788 = vmatprep.mubr.f32.mxu0 %v101_v56  ;;  %2983 = vmatprep.mubr.f32.mxu1 %v231_v57  ;;  %v259_v56 = vld [vmem:[%s4502_s0 + $0x770] sm:$0xff]  ;;  %v3123_v57 = vpack.c.bf16 %v2208_v54, %v2207_v53 }
  0xc3   :  { %3124 = vmatpush3.bf16.msra.mxu1 %v3123_v57  ;;  %v268_v57 = vld [vmem:[%s4502_s0 + $0x7b8] sm:$0xff] }
  0xc4   :  { %2789 = vmatmul.mubr.f32.gmra.mrb[80].mxu0 %v102_v58  ;;  %2984 = vmatmul.mubr.f32.gmra.mrb[80].mxu1 %v232_v59 }
  0xc5   :  { %2791 = vmatprep.mubr.f32.mxu0 %v103_v60  ;;  %2986 = vmatprep.mubr.f32.mxu1 %v233_v61 }
  0xc6   :  { %3125 = vmatprep.subr.bf16.mxu1 %v3193_v20 }
  0xc8   :  { %2792 = vmatmul.mubr.f32.gmra.mrb[82].mxu0 %v104_v62  ;;  %2987 = vmatmul.mubr.f32.gmra.mrb[82].mxu1 %v234_v63 }
  0xc9   :  { %2794 = vmatprep.mubr.f32.mxu0 %v105_v0  ;;  %2989 = vmatprep.mubr.f32.mxu1 %v235_v1  ;;  %v130_v0 = vld [vmem:[%s4502_s0 + $0x368] sm:$0xff]  ;;  %v260_v1 = vld [vmem:[%s4502_s0 + $0x778] sm:$0xff] }
  0xcc   :  { %2795 = vmatmul.mubr.f32.gmra.mrb[84].mxu0 %v106_v2  ;;  %2990 = vmatmul.mubr.f32.gmra.mrb[84].mxu1 %v236_v3  ;;  %v131_v3 = vld [vmem:[%s4502_s0 + $0x370] sm:$0xff] }
  0xcd   :  { %2797 = vmatprep.mubr.f32.mxu0 %v107_v4  ;;  %2992 = vmatprep.mubr.f32.mxu1 %v237_v5  ;;  %v261_v4 = vld [vmem:[%s4502_s0 + $0x780] sm:$0xff] }
  0xd0   :  { %2798 = vmatmul.mubr.f32.gmra.mrb[86].mxu0 %v108_v6  ;;  %2993 = vmatmul.mubr.f32.gmra.mrb[86].mxu1 %v238_v7 }
  0xd1   :  { %2800 = vmatprep.mubr.f32.mxu0 %v109_v8  ;;  %2995 = vmatprep.mubr.f32.mxu1 %v239_v9 }
  0xd4   :  { %2801 = vmatmul.mubr.f32.gmra.mrb[88].mxu0 %v110_v10  ;;  %2996 = vmatmul.mubr.f32.gmra.mrb[88].mxu1 %v240_v11 }
  0xd5   :  { %2803 = vmatprep.mubr.f32.mxu0 %v111_v12  ;;  %2998 = vmatprep.mubr.f32.mxu1 %v241_v13  ;;  %v132_v13 = vld [vmem:[%s4502_s0 + $0x378] sm:$0xff] }
  0xd8   :  { %2804 = vmatmul.mubr.f32.gmra.mrb[90].mxu0 %v112_v14  ;;  %2999 = vmatmul.mubr.f32.gmra.mrb[90].mxu1 %v242_v15  ;;  %v262_v14 = vld [vmem:[%s4502_s0 + $0x788] sm:$0xff]  ;;  %v133_v15 = vld [vmem:[%s4502_s0 + $0x380] sm:$0xff] }
  0xd9   :  { %2806 = vmatprep.mubr.f32.mxu0 %v113_v18  ;;  %3001 = vmatprep.mubr.f32.mxu1 %v243_v19 }
  0xdc   :  { %2807 = vmatmul.mubr.f32.gmra.mrb[92].mxu0 %v114_v22  ;;  %3002 = vmatmul.mubr.f32.gmra.mrb[92].mxu1 %v244_v23 }
  0xdd   :  { %2809 = vmatprep.mubr.f32.mxu0 %v115_v24  ;;  %3004 = vmatprep.mubr.f32.mxu1 %v245_v25 }
  0xe0   :  { %2810 = vmatmul.mubr.f32.gmra.mrb[94].mxu0 %v116_v26  ;;  %3005 = vmatmul.mubr.f32.gmra.mrb[94].mxu1 %v246_v27  ;;  %v134_v27 = vld [vmem:[%s4502_s0 + $0x388] sm:$0xff] }
  0xe1   :  { %2812 = vmatprep.mubr.f32.mxu0 %v117_v28  ;;  %3007 = vmatprep.mubr.f32.mxu1 %v247_v29  ;;  %v264_v28 = vld [vmem:[%s4502_s0 + $0x798] sm:$0xff]  ;;  %v135_v29 = vld [vmem:[%s4502_s0 + $0x390] sm:$0xff] }
  0xe4   :  { %2813 = vmatmul.mubr.f32.gmra.mrb[96].mxu0 %v118_v30  ;;  %3008 = vmatmul.mubr.f32.gmra.mrb[96].mxu1 %v248_v31  ;;  %v265_v30 = vld [vmem:[%s4502_s0 + $0x7a0] sm:$0xff] }
  0xe5   :  { %2815 = vmatprep.mubr.f32.mxu0 %v119_v32  ;;  %3010 = vmatprep.mubr.f32.mxu1 %v249_v33 }
  0xe8   :  { %2816 = vmatmul.mubr.f32.gmra.mrb[98].mxu0 %v120_v34  ;;  %3011 = vmatmul.mubr.f32.gmra.mrb[98].mxu1 %v250_v35 }
  0xe9   :  { %2818 = vmatprep.mubr.f32.mxu0 %v121_v36  ;;  %3013 = vmatprep.mubr.f32.mxu1 %v251_v37 }
  0xec   :  { %2819 = vmatmul.mubr.f32.gmra.mrb[100].mxu0 %v122_v38  ;;  %3014 = vmatmul.mubr.f32.gmra.mrb[100].mxu1 %v252_v39 }
  0xed   :  { %2821 = vmatprep.mubr.f32.mxu0 %v123_v40  ;;  %3016 = vmatprep.mubr.f32.mxu1 %v253_v41  ;;  %v136_v41 = vld [vmem:[%s4502_s0 + $0x398] sm:$0xff] }
  0xf0   :  { %2822 = vmatmul.mubr.f32.gmra.mrb[102].mxu0 %v124_v42  ;;  %3017 = vmatmul.mubr.f32.gmra.mrb[102].mxu1 %v254_v43  ;;  %v266_v42 = vld [vmem:[%s4502_s0 + $0x7a8] sm:$0xff]  ;;  %v137_v43 = vld [vmem:[%s4502_s0 + $0x3a0] sm:$0xff] }
  0xf1   :  { %2824 = vmatprep.mubr.f32.mxu0 %v125_v44  ;;  %3019 = vmatprep.mubr.f32.mxu1 %v255_v45  ;;  %v267_v44 = vld [vmem:[%s4502_s0 + $0x7b0] sm:$0xff] }
  0xf4   :  { %2825 = vmatmul.mubr.f32.gmra.mrb[104].mxu0 %v126_v46  ;;  %3020 = vmatmul.mubr.f32.gmra.mrb[104].mxu1 %v256_v47 }
  0xf5   :  { %2827 = vmatprep.mubr.f32.mxu0 %v127_v48  ;;  %3022 = vmatprep.mubr.f32.mxu1 %v257_v49 }
  0xf7   :  { %v2670_v58 = vpop.f32.mrb[0].mxu0  ;;  %v3948_v59 = vpop.f32.mrb[0].mxu1 }
  0xf8   :  { %v372_v60 = vadd.f32 %v2670_v58, %v3928_v50  ;;  %v366_v61 = vpop.f32.mrb[1].mxu0  ;;  %2828 = vmatmul.mubr.f32.gmra.mrb[106].mxu0 %v128_v51  ;;  %3023 = vmatmul.mubr.f32.gmra.mrb[106].mxu1 %v258_v52  ;;  %v3951_v62 = vpop.f32.mrb[1].mxu1  ;;  %v139_v58 = vld [vmem:[%s4502_s0 + $0x3b0] sm:$0xff] }
  0xf9   :  { %v367_v63 = vadd.f32 %v3928_v50, %v366_v61  ;;  %2830 = vmatprep.mubr.f32.mxu0 %v129_v55  ;;  %3025 = vmatprep.mubr.f32.mxu1 %v259_v56  ;;  %v138_v56 = vld [vmem:[%s4502_s0 + $0x3a8] sm:$0xff] }
  0xfa   :  { %v1646_v2 = vmax.f32 %v372_v60, 0.0  ;;  %v269_v60 = vld [vmem:[%s4502_s0 + $0x7c0] sm:$0xff] }
  0xfb   :  { %v1645_v5 = vmax.f32 %v367_v63, 0.0  ;;  %v2673_v6 = vpop.f32.mrb[2].mxu0  ;;  %v3966_v7 = vpop.f32.mrb[2].mxu1 }
  0xfc   :  { %v376_v8 = vpop.f32.mrb[3].mxu0  ;;  %2831 = vmatmul.mubr.f32.gmra.mrb[108].mxu0 %v130_v0  ;;  %3026 = vmatmul.mubr.f32.gmra.mrb[108].mxu1 %v260_v1  ;;  %v3969_v9 = vpop.f32.mrb[3].mxu1  ;;  %v382_v11 = vadd.f32 %v2673_v6, %v3928_v50 }
  0xfd   :  { %v1901_v10 = vadd.f32 %v1646_v2, %v1645_v5  ;;  %v377_v12 = vadd.f32 %v3928_v50, %v376_v8  ;;  %2833 = vmatprep.mubr.f32.mxu0 %v131_v3  ;;  %3028 = vmatprep.mubr.f32.mxu1 %v261_v4 }
  0xfe   :  { %v1648_v23 = vmax.f32 %v382_v11, 0.0  ;;  %v270_v11 = vld [vmem:[%s4502_s0 + $0x7c8] sm:$0xff] }
  0xff   :  { %v1647_v17 = vmax.f32 %v377_v12, 0.0  ;;  %v2676_v18 = vpop.f32.mrb[4].mxu0  ;;  %v3985_v19 = vpop.f32.mrb[4].mxu1  ;;  %v141_v12 = vld [vmem:[%s4502_s0 + $0x3c0] sm:$0xff] }
 0x100   :  { %v386_v21 = vpop.f32.mrb[5].mxu0  ;;  %2834 = vmatmul.mubr.f32.gmra.mrb[110].mxu0 %v132_v13  ;;  %3029 = vmatmul.mubr.f32.gmra.mrb[110].mxu1 %v262_v14  ;;  %v3987_v22 = vpop.f32.mrb[5].mxu1  ;;  %v392_v25 = vadd.f32 %v2676_v18, %v3928_v50  ;;  %v271_v13 = vld [vmem:[%s4502_s0 + $0x7d0] sm:$0xff] }
 0x101   :  { %v1902_v24 = vadd.f32 %v1901_v10, %v1647_v17  ;;  %v387_v26 = vadd.f32 %v3928_v50, %v386_v21  ;;  %2836 = vmatprep.mubr.f32.mxu0 %v133_v15  ;;  %3031 = vmatprep.mubr.f32.mxu1 %v263_v16  ;;  %v140_v10 = vld [vmem:[%s4502_s0 + $0x3b8] sm:$0xff] }
 0x102   :  { %v1650_v37 = vmax.f32 %v392_v25, 0.0 }
 0x103   :  { %v1649_v31 = vmax.f32 %v387_v26, 0.0  ;;  %v1903_v32 = vadd.f32 %v1902_v24, %v1648_v23  ;;  %v2679_v33 = vpop.f32.mrb[6].mxu0  ;;  %v4003_v34 = vpop.f32.mrb[6].mxu1 }
 0x104   :  { %v396_v35 = vpop.f32.mrb[7].mxu0  ;;  %2837 = vmatmul.mubr.f32.gmra.mrb[112].mxu0 %v134_v27  ;;  %3032 = vmatmul.mubr.f32.gmra.mrb[112].mxu1 %v264_v28  ;;  %v4005_v36 = vpop.f32.mrb[7].mxu1  ;;  %v402_v39 = vadd.f32 %v2679_v33, %v3928_v50  ;;  %v142_v27 = vld [vmem:[%s4502_s0 + $0x3c8] sm:$0xff]  ;;  %v272_v28 = vld [vmem:[%s4502_s0 + $0x7d8] sm:$0xff] }
 0x105   :  { %v1904_v38 = vadd.f32 %v1903_v32, %v1649_v31  ;;  %v397_v40 = vadd.f32 %v3928_v50, %v396_v35  ;;  %2839 = vmatprep.mubr.f32.mxu0 %v135_v29  ;;  %3034 = vmatprep.mubr.f32.mxu1 %v265_v30  ;;  %v143_v29 = vld [vmem:[%s4502_s0 + $0x3d0] sm:$0xff]  ;;  %v273_v30 = vld [vmem:[%s4502_s0 + $0x7e0] sm:$0xff] }
 0x106   :  { %v1652_v52 = vmax.f32 %v402_v39, 0.0 }
 0x107   :  { %v1651_v45 = vmax.f32 %v397_v40, 0.0  ;;  %v1905_v46 = vadd.f32 %v1904_v38, %v1650_v37  ;;  %v2682_v47 = vpop.f32.mrb[8].mxu0  ;;  %v4021_v48 = vpop.f32.mrb[8].mxu1  ;;  %v144_v38 = vld [vmem:[%s4502_s0 + $0x3d8] sm:$0xff] }
 0x108   :  { %v406_v49 = vpop.f32.mrb[9].mxu0  ;;  %2840 = vmatmul.mubr.f32.gmra.mrb[114].mxu0 %v136_v41  ;;  %3035 = vmatmul.mubr.f32.gmra.mrb[114].mxu1 %v266_v42  ;;  %v4023_v51 = vpop.f32.mrb[9].mxu1  ;;  %v412_v54 = vadd.f32 %v2682_v47, %v3928_v50  ;;  %v145_v47 = vld [vmem:[%s4502_s0 + $0x3e0] sm:$0xff] }
 0x109   :  { %v1906_v53 = vadd.f32 %v1905_v46, %v1651_v45  ;;  %v407_v55 = vadd.f32 %v3928_v50, %v406_v49  ;;  %2842 = vmatprep.mubr.f32.mxu0 %v137_v43  ;;  %3037 = vmatprep.mubr.f32.mxu1 %v267_v44  ;;  %v274_v44 = vld [vmem:[%s4502_s0 + $0x7e8] sm:$0xff]  ;;  %v2209_v45 = vld [vmem:[%s4505_s3 + $0x20] sm:$0xff]  ;;  %v275_v49 = vld [vmem:[%s4502_s0 + $0x7f0] sm:$0xff] }
 0x10a   :  { %v1654_v4 = vmax.f32 %v412_v54, 0.0  ;;  %v2210_v46 = vld [vmem:[%s4505_s3 + $0x28] sm:$0xff] }
 0x10b   :  { %v1653_v61 = vmax.f32 %v407_v55, 0.0  ;;  %v1907_v63 = vadd.f32 %v1906_v53, %v1652_v52  ;;  %v2685_v0 = vpop.f32.mrb[10].mxu0  ;;  %v4039_v1 = vpop.f32.mrb[10].mxu1  ;;  %v3126_v52 = vpack.c.bf16 %v2210_v46, %v2209_v45 }
 0x10c   :  { %v416_v2 = vpop.f32.mrb[11].mxu0  ;;  %2843 = vmatmul.mubr.f32.gmra.mrb[116].mxu0 %v138_v56  ;;  %3038 = vmatmul.mubr.f32.gmra.mrb[116].mxu1 %v268_v57  ;;  %v4041_v3 = vpop.f32.mrb[11].mxu1  ;;  %v422_v6 = vadd.f32 %v2685_v0, %v3928_v50 }
 0x10d   :  { %v1908_v5 = vadd.f32 %v1907_v63, %v1653_v61  ;;  %v417_v8 = vadd.f32 %v3928_v50, %v416_v2  ;;  %2845 = vmatprep.mubr.f32.mxu0 %v139_v58  ;;  %3040 = vmatprep.mubr.f32.mxu1 %v269_v60  ;;  %v146_v2 = vld [vmem:[%s4502_s0 + $0x3e8] sm:$0xff] }
 0x10e   :  { %v1656_v23 = vmax.f32 %v422_v6, 0.0  ;;  %3127 = vmatpush3.bf16.msra.mxu1 %v3126_v52 }
 0x10f   :  { %v1655_v14 = vmax.f32 %v417_v8, 0.0  ;;  %v1909_v15 = vadd.f32 %v1908_v5, %v1654_v4  ;;  %v2688_v16 = vpop.f32.mrb[12].mxu0  ;;  %v4057_v17 = vpop.f32.mrb[12].mxu1  ;;  %v276_v4 = vld [vmem:[%s4502_s0 + $0x7f8] sm:$0xff]  ;;  %v147_v5 = vld [vmem:[%s4502_s0 + $0x3f0] sm:$0xff]  ;;  %3128 = vmatprep.subr.bf16.mxu1 %v3193_v20 }
 0x110   :  { %v426_v18 = vpop.f32.mrb[13].mxu0  ;;  %2846 = vmatmul.mubr.f32.gmra.mrb[118].mxu0 %v140_v10  ;;  %3041 = vmatmul.mubr.f32.gmra.mrb[118].mxu1 %v270_v11  ;;  %v4059_v21 = vpop.f32.mrb[13].mxu1  ;;  %v432_v25 = vadd.f32 %v2688_v16, %v3928_v50 }
 0x111   :  { %v1910_v24 = vadd.f32 %v1909_v15, %v1655_v14  ;;  %v427_v26 = vadd.f32 %v3928_v50, %v426_v18  ;;  %2848 = vmatprep.mubr.f32.mxu0 %v141_v12  ;;  %3043 = vmatprep.mubr.f32.mxu1 %v271_v13 }
 0x112   :  { %v1658_v40 = vmax.f32 %v432_v25, 0.0 }
 0x113   :  { %v1657_v31 = vmax.f32 %v427_v26, 0.0  ;;  %v1911_v32 = vadd.f32 %v1910_v24, %v1656_v23  ;;  %v2691_v33 = vpop.f32.mrb[14].mxu0  ;;  %v4075_v35 = vpop.f32.mrb[14].mxu1  ;;  %v148_v23 = vld [vmem:[%s4502_s0 + $0x3f8] sm:$0xff]  ;;  %v149_v24 = vld [vmem:[%s4502_s0 + $0x400] sm:$0xff] }
 0x114   :  { %v436_v37 = vpop.f32.mrb[15].mxu0  ;;  %2849 = vmatmul.mubr.f32.gmra.mrb[120].mxu0 %v142_v27  ;;  %3044 = vmatmul.mubr.f32.gmra.mrb[120].mxu1 %v272_v28  ;;  %v4080_v39 = vpop.f32.mrb[15].mxu1  ;;  %v442_v42 = vadd.f32 %v2691_v33, %v3928_v50 }
 0x115   :  { %v1912_v41 = vadd.f32 %v1911_v32, %v1657_v31  ;;  %v437_v43 = vadd.f32 %v3928_v50, %v436_v37  ;;  %2851 = vmatprep.mubr.f32.mxu0 %v143_v29  ;;  %3046 = vmatprep.mubr.f32.mxu1 %v273_v30 }
 0x116   :  { %v1660_v60 = vmax.f32 %v442_v42, 0.0 }
 0x117   :  { %v1659_v53 = vmax.f32 %v437_v43, 0.0  ;;  %v1913_v54 = vadd.f32 %v1912_v41, %v1658_v40  ;;  %v2694_v55 = vpop.f32.mrb[16].mxu0  ;;  %v4099_v56 = vpop.f32.mrb[16].mxu1 }
 0x118   :  { %v446_v57 = vpop.f32.mrb[17].mxu0  ;;  %2852 = vmatmul.mubr.f32.gmra.mrb[122].mxu0 %v144_v38  ;;  %3047 = vmatmul.mubr.f32.gmra.mrb[122].mxu1 %v274_v44  ;;  %v4101_v58 = vpop.f32.mrb[17].mxu1  ;;  %v452_v63 = vadd.f32 %v2694_v55, %v3928_v50  ;;  %v150_v38 = vld [vmem:[%s4502_s0 + $0x408] sm:$0xff] }
 0x119   :  { %v1914_v61 = vadd.f32 %v1913_v54, %v1659_v53  ;;  %v447_v0 = vadd.f32 %v3928_v50, %v446_v57  ;;  %2854 = vmatprep.mubr.f32.mxu0 %v145_v47  ;;  %3049 = vmatprep.mubr.f32.mxu1 %v275_v49 }
 0x11a   :  { %v1662_v14 = vmax.f32 %v452_v63, 0.0 }
 0x11b   :  { %v1661_v6 = vmax.f32 %v447_v0, 0.0  ;;  %v1915_v8 = vadd.f32 %v1914_v61, %v1660_v60  ;;  %v2697_v10 = vpop.f32.mrb[18].mxu0  ;;  %v4114_v11 = vpop.f32.mrb[18].mxu1 }
 0x11c   :  { %v456_v12 = vpop.f32.mrb[19].mxu0  ;;  %2855 = vmatmul.mubr.f32.gmra.mrb[124].mxu0 %v146_v2  ;;  %3050 = vmatmul.mubr.f32.gmra.mrb[124].mxu1 %v276_v4  ;;  %v4117_v13 = vpop.f32.mrb[19].mxu1  ;;  %v462_v16 = vadd.f32 %v2697_v10, %v3928_v50 }
 0x11d   :  { %v1916_v15 = vadd.f32 %v1915_v8, %v1661_v6  ;;  %v457_v18 = vadd.f32 %v3928_v50, %v456_v12  ;;  %2857 = vmatprep.mubr.f32.mxu0 %v147_v5 }
 0x11e   :  { %v1664_v31 = vmax.f32 %v462_v16, 0.0 }
 0x11f   :  { %v1663_v25 = vmax.f32 %v457_v18, 0.0  ;;  %v1917_v26 = vadd.f32 %v1916_v15, %v1662_v14  ;;  %v2700_v27 = vpop.f32.mrb[20].mxu0  ;;  %v4127_v28 = vpop.f32.mrb[20].mxu1 }
 0x120   :  { %v466_v29 = vpop.f32.mrb[21].mxu0  ;;  %2858 = vmatmul.mubr.f32.gmra.mrb[126].mxu0 %v148_v23  ;;  %v4129_v30 = vpop.f32.mrb[21].mxu1  ;;  %v472_v33 = vadd.f32 %v2700_v27, %v3928_v50 }
 0x121   :  { %v1918_v32 = vadd.f32 %v1917_v26, %v1663_v25  ;;  %v467_v37 = vadd.f32 %v3928_v50, %v466_v29  ;;  %2860 = vmatprep.mubr.f32.mxu0 %v149_v24 }
 0x122   :  { %v1666_v46 = vmax.f32 %v472_v33, 0.0 }
 0x123   :  { %v1665_v40 = vmax.f32 %v467_v37, 0.0  ;;  %v1919_v41 = vadd.f32 %v1918_v32, %v1664_v31  ;;  %v2703_v42 = vpop.f32.mrb[22].mxu0  ;;  %v4136_v43 = vpop.f32.mrb[22].mxu1 }
 0x124   :  { %v476_v44 = vpop.f32.mrb[23].mxu0  ;;  %2861 = vmatmul.mubr.f32.gmra.mrb[128].mxu0 %v150_v38  ;;  %v4138_v45 = vpop.f32.mrb[23].mxu1  ;;  %v482_v49 = vadd.f32 %v2703_v42, %v3928_v50 }
 0x125   :  { %v1920_v47 = vadd.f32 %v1919_v41, %v1665_v40  ;;  %v477_v52 = vadd.f32 %v3928_v50, %v476_v44 }
 0x126   :  { %v1668_v63 = vmax.f32 %v482_v49, 0.0 }
 0x127   :  { %v1667_v53 = vmax.f32 %v477_v52, 0.0  ;;  %v1921_v54 = vadd.f32 %v1920_v47, %v1666_v46  ;;  %v2706_v55 = vpop.f32.mrb[24].mxu0  ;;  %v4142_v57 = vpop.f32.mrb[24].mxu1 }
 0x128   :  { %v486_v60 = vpop.f32.mrb[25].mxu0  ;;  %v4144_v61 = vpop.f32.mrb[25].mxu1  ;;  %v492_v2 = vadd.f32 %v2706_v55, %v3928_v50 }
 0x129   :  { %v1922_v0 = vadd.f32 %v1921_v54, %v1667_v53  ;;  %v487_v4 = vadd.f32 %v3928_v50, %v486_v60 }
 0x12a   :  { %v1670_v15 = vmax.f32 %v492_v2, 0.0 }
 0x12b   :  { %v1669_v5 = vmax.f32 %v487_v4, 0.0  ;;  %v1923_v6 = vadd.f32 %v1922_v0, %v1668_v63  ;;  %v2709_v8 = vpop.f32.mrb[26].mxu0  ;;  %v4148_v10 = vpop.f32.mrb[26].mxu1  ;;  %v2211_v63 = vld [vmem:[%s4505_s3 + $0x30] sm:$0xff]  ;;  %v2212_v0 = vld [vmem:[%s4505_s3 + $0x38] sm:$0xff] }
 0x12c   :  { %v496_v12 = vpop.f32.mrb[27].mxu0  ;;  %v4150_v14 = vpop.f32.mrb[27].mxu1  ;;  %v502_v18 = vadd.f32 %v2709_v8, %v3928_v50  ;;  %v3129_v4 = vpack.c.bf16 %v2212_v0, %v2211_v63 }
 0x12d   :  { %v1924_v16 = vadd.f32 %v1923_v6, %v1669_v5  ;;  %v497_v23 = vadd.f32 %v3928_v50, %v496_v12 }
 0x12e   :  { %v1672_v32 = vmax.f32 %v502_v18, 0.0  ;;  %3130 = vmatpush3.bf16.msra.mxu1 %v3129_v4 }
 0x12f   :  { %v1671_v24 = vmax.f32 %v497_v23, 0.0  ;;  %v1925_v25 = vadd.f32 %v1924_v16, %v1670_v15  ;;  %v2712_v26 = vpop.f32.mrb[28].mxu0  ;;  %v4154_v27 = vpop.f32.mrb[28].mxu1  ;;  %3131 = vmatprep.subr.bf16.mxu1 %v3193_v20 }
 0x130   :  { %v506_v29 = vpop.f32.mrb[29].mxu0  ;;  %v4156_v31 = vpop.f32.mrb[29].mxu1  ;;  %v512_v37 = vadd.f32 %v2712_v26, %v3928_v50 }
 0x131   :  { %v1926_v33 = vadd.f32 %v1925_v25, %v1671_v24  ;;  %v507_v38 = vadd.f32 %v3928_v50, %v506_v29 }
 0x132   :  { %v1674_v53 = vmax.f32 %v512_v37, 0.0 }
 0x133   :  { %v1673_v40 = vmax.f32 %v507_v38, 0.0  ;;  %v1927_v41 = vadd.f32 %v1926_v33, %v1672_v32  ;;  %v2715_v42 = vpop.f32.mrb[30].mxu0  ;;  %v2910_v44 = vpop.f32.mrb[30].mxu1 }
 0x134   :  { %v522_v46 = vadd.f32 %v2715_v42, %v3928_v50  ;;  %v516_v47 = vpop.f32.mrb[31].mxu0  ;;  %v1172_v49 = vadd.f32 %v2910_v44, %v3928_v50  ;;  %v1166_v52 = vpop.f32.mrb[31].mxu1 }
 0x135   :  { %v1928_v54 = vadd.f32 %v1927_v41, %v1673_v40  ;;  %v517_v55 = vadd.f32 %v3928_v50, %v516_v47  ;;  %v1167_v60 = vadd.f32 %v3928_v50, %v1166_v52 }
 0x136   :  { %v1806_v2 = vmax.f32 %v1172_v49, 0.0  ;;  %v1676_v16 = vmax.f32 %v522_v46, 0.0 }
 0x137   :  { %v1675_v5 = vmax.f32 %v517_v55, 0.0  ;;  %v1929_v6 = vadd.f32 %v1928_v54, %v1674_v53  ;;  %v2718_v8 = vpop.f32.mrb[32].mxu0  ;;  %v1805_v12 = vmax.f32 %v1167_v60, 0.0  ;;  %v2913_v15 = vpop.f32.mrb[32].mxu1 }
 0x138   :  { %v532_v18 = vadd.f32 %v2718_v8, %v3928_v50  ;;  %v526_v23 = vpop.f32.mrb[33].mxu0  ;;  %v1182_v24 = vadd.f32 %v2913_v15, %v3928_v50  ;;  %v1176_v25 = vpop.f32.mrb[33].mxu1 }
 0x139   :  { %v1930_v26 = vadd.f32 %v1929_v6, %v1675_v5  ;;  %v527_v29 = vadd.f32 %v3928_v50, %v526_v23  ;;  %v2086_v32 = vadd.f32 %v1806_v2, %v1805_v12  ;;  %v1177_v33 = vadd.f32 %v3928_v50, %v1176_v25 }
 0x13a   :  { %v1678_v37 = vmax.f32 %v532_v18, 0.0  ;;  %v1808_v42 = vmax.f32 %v1182_v24, 0.0 }
 0x13b   :  { %v4175_v38 = vadd.f32 %v1930_v26, %v1676_v16  ;;  %v1677_v40 = vmax.f32 %v527_v29, 0.0  ;;  %v2721_v41 = vpop.f32.mrb[34].mxu0  ;;  %v1807_v44 = vmax.f32 %v1177_v33, 0.0  ;;  %v2916_v46 = vpop.f32.mrb[34].mxu1 }
 0x13c   :  { %v542_v47 = vadd.f32 %v2721_v41, %v3928_v50  ;;  %v536_v49 = vpop.f32.mrb[35].mxu0  ;;  %v1192_v52 = vadd.f32 %v2916_v46, %v3928_v50  ;;  %v1186_v53 = vpop.f32.mrb[35].mxu1 }
 0x13d   :  { %v1938_v54 = vadd.f32 %v1678_v37, %v1677_v40  ;;  %v537_v55 = vadd.f32 %v3928_v50, %v536_v49  ;;  %v2087_v60 = vadd.f32 %v2086_v32, %v1807_v44  ;;  %v1187_v63 = vadd.f32 %v3928_v50, %v1186_v53 }
 0x13e   :  { %v1680_v6 = vmax.f32 %v542_v47, 0.0  ;;  %v1810_v12 = vmax.f32 %v1192_v52, 0.0 }
 0x13f   :  { %v1679_v0 = vmax.f32 %v537_v55, 0.0  ;;  %v2724_v2 = vpop.f32.mrb[36].mxu0  ;;  %v2088_v4 = vadd.f32 %v2087_v60, %v1808_v42  ;;  %v2919_v5 = vpop.f32.mrb[36].mxu1  ;;  %v1809_v15 = vmax.f32 %v1187_v63, 0.0 }
 0x140   :  { %v546_v8 = vpop.f32.mrb[37].mxu0  ;;  %v1202_v16 = vadd.f32 %v2919_v5, %v3928_v50  ;;  %v1196_v18 = vpop.f32.mrb[37].mxu1  ;;  %v552_v24 = vadd.f32 %v2724_v2, %v3928_v50 }
 0x141   :  { %v1939_v23 = vadd.f32 %v1938_v54, %v1679_v0  ;;  %v547_v25 = vadd.f32 %v3928_v50, %v546_v8  ;;  %v1197_v26 = vadd.f32 %v3928_v50, %v1196_v18  ;;  %v2089_v29 = vadd.f32 %v2088_v4, %v1809_v15 }
 0x142   :  { %v1812_v46 = vmax.f32 %v1202_v16, 0.0  ;;  %v1682_v53 = vmax.f32 %v552_v24, 0.0 }
 0x143   :  { %v1681_v32 = vmax.f32 %v547_v25, 0.0  ;;  %v1940_v33 = vadd.f32 %v1939_v23, %v1680_v6  ;;  %v2727_v37 = vpop.f32.mrb[38].mxu0  ;;  %v1811_v40 = vmax.f32 %v1197_v26, 0.0  ;;  %v2922_v41 = vpop.f32.mrb[38].mxu1  ;;  %v2090_v47 = vadd.f32 %v2089_v29, %v1810_v12 }
 0x144   :  { %v562_v42 = vadd.f32 %v2727_v37, %v3928_v50  ;;  %v556_v44 = vpop.f32.mrb[39].mxu0  ;;  %v1212_v49 = vadd.f32 %v2922_v41, %v3928_v50  ;;  %v1206_v52 = vpop.f32.mrb[39].mxu1 }
 0x145   :  { %v1941_v54 = vadd.f32 %v1940_v33, %v1681_v32  ;;  %v557_v55 = vadd.f32 %v3928_v50, %v556_v44  ;;  %v1207_v60 = vadd.f32 %v3928_v50, %v1206_v52  ;;  %v2091_v63 = vadd.f32 %v2090_v47, %v1811_v40 }
 0x146   :  { %v1684_v8 = vmax.f32 %v562_v42, 0.0  ;;  %v1814_v18 = vmax.f32 %v1212_v49, 0.0 }
 0x147   :  { %v1683_v0 = vmax.f32 %v557_v55, 0.0  ;;  %v1942_v2 = vadd.f32 %v1941_v54, %v1682_v53  ;;  %v2730_v4 = vpop.f32.mrb[40].mxu0  ;;  %v1813_v5 = vmax.f32 %v1207_v60, 0.0  ;;  %v2925_v6 = vpop.f32.mrb[40].mxu1  ;;  %v2092_v16 = vadd.f32 %v2091_v63, %v1812_v46 }
 0x148   :  { %v566_v15 = vpop.f32.mrb[41].mxu0  ;;  %v1222_v12 = vadd.f32 %v2925_v6, %v3928_v50  ;;  %v1216_v23 = vpop.f32.mrb[41].mxu1  ;;  %v572_v24 = vadd.f32 %v2730_v4, %v3928_v50 }
 0x149   :  { %v1943_v25 = vadd.f32 %v1942_v2, %v1683_v0  ;;  %v567_v26 = vadd.f32 %v3928_v50, %v566_v15  ;;  %v1217_v29 = vadd.f32 %v3928_v50, %v1216_v23  ;;  %v2093_v32 = vadd.f32 %v2092_v16, %v1813_v5 }
 0x14a   :  { %v1816_v46 = vmax.f32 %v1222_v12, 0.0  ;;  %v1686_v54 = vmax.f32 %v572_v24, 0.0 }
 0x14b   :  { %v1685_v33 = vmax.f32 %v567_v26, 0.0  ;;  %v1944_v37 = vadd.f32 %v1943_v25, %v1684_v8  ;;  %v2733_v40 = vpop.f32.mrb[42].mxu0  ;;  %v1815_v41 = vmax.f32 %v1217_v29, 0.0  ;;  %v2928_v44 = vpop.f32.mrb[42].mxu1  ;;  %v2094_v49 = vadd.f32 %v2093_v32, %v1814_v18 }
 0x14c   :  { %v582_v42 = vadd.f32 %v2733_v40, %v3928_v50  ;;  %v576_v47 = vpop.f32.mrb[43].mxu0  ;;  %v1232_v52 = vadd.f32 %v2928_v44, %v3928_v50  ;;  %v1226_v53 = vpop.f32.mrb[43].mxu1  ;;  %v2214_v40 = vld [vmem:[%s4505_s3 + $0x48] sm:$0xff] }
 0x14d   :  { %v1945_v55 = vadd.f32 %v1944_v37, %v1685_v33  ;;  %v577_v60 = vadd.f32 %v3928_v50, %v576_v47  ;;  %v1227_v63 = vadd.f32 %v3928_v50, %v1226_v53  ;;  %v2095_v0 = vadd.f32 %v2094_v49, %v1815_v41  ;;  %v2213_v37 = vld [vmem:[%s4505_s3 + $0x40] sm:$0xff] }
 0x14e   :  { %v1688_v15 = vmax.f32 %v582_v42, 0.0  ;;  %v1818_v23 = vmax.f32 %v1232_v52, 0.0  ;;  %v3132_v49 = vpack.c.bf16 %v2214_v40, %v2213_v37 }
 0x14f   :  { %v1687_v2 = vmax.f32 %v577_v60, 0.0  ;;  %v1946_v4 = vadd.f32 %v1945_v55, %v1686_v54  ;;  %v2736_v5 = vpop.f32.mrb[44].mxu0  ;;  %v1817_v6 = vmax.f32 %v1227_v63, 0.0  ;;  %v2931_v8 = vpop.f32.mrb[44].mxu1  ;;  %v2096_v12 = vadd.f32 %v2095_v0, %v1816_v46 }
 0x150   :  { %v586_v16 = vpop.f32.mrb[45].mxu0  ;;  %v1242_v18 = vadd.f32 %v2931_v8, %v3928_v50  ;;  %v1236_v25 = vpop.f32.mrb[45].mxu1  ;;  %v592_v24 = vadd.f32 %v2736_v5, %v3928_v50  ;;  %3133 = vmatpush3.bf16.msra.mxu1 %v3132_v49 }
 0x151   :  { %v1947_v26 = vadd.f32 %v1946_v4, %v1687_v2  ;;  %v587_v29 = vadd.f32 %v3928_v50, %v586_v16  ;;  %v1237_v32 = vadd.f32 %v3928_v50, %v1236_v25  ;;  %v2097_v33 = vadd.f32 %v2096_v12, %v1817_v6  ;;  %3134 = vmatprep.subr.bf16.mxu1 %v3193_v20 }
 0x152   :  { %v1820_v54 = vmax.f32 %v1242_v18, 0.0  ;;  %v1690_v0 = vmax.f32 %v592_v24, 0.0 }
 0x153   :  { %v1689_v41 = vmax.f32 %v587_v29, 0.0  ;;  %v1948_v44 = vadd.f32 %v1947_v26, %v1688_v15  ;;  %v2739_v42 = vpop.f32.mrb[46].mxu0  ;;  %v1819_v47 = vmax.f32 %v1237_v32, 0.0  ;;  %v2934_v46 = vpop.f32.mrb[46].mxu1  ;;  %v2098_v55 = vadd.f32 %v2097_v33, %v1818_v23 }
 0x154   :  { %v602_v52 = vadd.f32 %v2739_v42, %v3928_v50  ;;  %v596_v53 = vpop.f32.mrb[47].mxu0  ;;  %v1252_v60 = vadd.f32 %v2934_v46, %v3928_v50  ;;  %v1246_v63 = vpop.f32.mrb[47].mxu1 }
 0x155   :  { %v1949_v2 = vadd.f32 %v1948_v44, %v1689_v41  ;;  %v597_v4 = vadd.f32 %v3928_v50, %v596_v53  ;;  %v1247_v5 = vadd.f32 %v3928_v50, %v1246_v63  ;;  %v2099_v6 = vadd.f32 %v2098_v55, %v1819_v47 }
 0x156   :  { %v1692_v18 = vmax.f32 %v602_v52, 0.0  ;;  %v1822_v26 = vmax.f32 %v1252_v60, 0.0 }
 0x157   :  { %v1691_v8 = vmax.f32 %v597_v4, 0.0  ;;  %v1950_v15 = vadd.f32 %v1949_v2, %v1690_v0  ;;  %v2742_v16 = vpop.f32.mrb[48].mxu0  ;;  %v1821_v12 = vmax.f32 %v1247_v5, 0.0  ;;  %v2937_v25 = vpop.f32.mrb[48].mxu1  ;;  %v2100_v29 = vadd.f32 %v2099_v6, %v1820_v54 }
 0x158   :  { %v606_v23 = vpop.f32.mrb[49].mxu0  ;;  %v1262_v24 = vadd.f32 %v2937_v25, %v3928_v50  ;;  %v1256_v32 = vpop.f32.mrb[49].mxu1  ;;  %v612_v37 = vadd.f32 %v2742_v16, %v3928_v50 }
 0x159   :  { %v1951_v33 = vadd.f32 %v1950_v15, %v1691_v8  ;;  %v607_v40 = vadd.f32 %v3928_v50, %v606_v23  ;;  %v1257_v41 = vadd.f32 %v3928_v50, %v1256_v32  ;;  %v2101_v44 = vadd.f32 %v2100_v29, %v1821_v12 }
 0x15a   :  { %v1824_v54 = vmax.f32 %v1262_v24, 0.0  ;;  %v1694_v2 = vmax.f32 %v612_v37, 0.0 }
 0x15b   :  { %v1693_v42 = vmax.f32 %v607_v40, 0.0  ;;  %v1952_v47 = vadd.f32 %v1951_v33, %v1692_v18  ;;  %v2745_v46 = vpop.f32.mrb[50].mxu0  ;;  %v1823_v49 = vmax.f32 %v1257_v41, 0.0  ;;  %v2940_v53 = vpop.f32.mrb[50].mxu1  ;;  %v2102_v60 = vadd.f32 %v2101_v44, %v1822_v26 }
 0x15c   :  { %v622_v52 = vadd.f32 %v2745_v46, %v3928_v50  ;;  %v616_v55 = vpop.f32.mrb[51].mxu0  ;;  %v1272_v63 = vadd.f32 %v2940_v53, %v3928_v50  ;;  %v1266_v0 = vpop.f32.mrb[51].mxu1 }
 0x15d   :  { %v1953_v4 = vadd.f32 %v1952_v47, %v1693_v42  ;;  %v617_v5 = vadd.f32 %v3928_v50, %v616_v55  ;;  %v1267_v6 = vadd.f32 %v3928_v50, %v1266_v0  ;;  %v2103_v8 = vadd.f32 %v2102_v60, %v1823_v49 }
 0x15e   :  { %v1696_v23 = vmax.f32 %v622_v52, 0.0  ;;  %v1826_v32 = vmax.f32 %v1272_v63, 0.0 }
 0x15f   :  { %v1695_v15 = vmax.f32 %v617_v5, 0.0  ;;  %v1954_v16 = vadd.f32 %v1953_v4, %v1694_v2  ;;  %v2748_v12 = vpop.f32.mrb[52].mxu0  ;;  %v1825_v25 = vmax.f32 %v1267_v6, 0.0  ;;  %v2943_v18 = vpop.f32.mrb[52].mxu1  ;;  %v2104_v24 = vadd.f32 %v2103_v8, %v1824_v54 }
 0x160   :  { %v626_v29 = vpop.f32.mrb[53].mxu0  ;;  %v1282_v26 = vadd.f32 %v2943_v18, %v3928_v50  ;;  %v1276_v33 = vpop.f32.mrb[53].mxu1  ;;  %v632_v37 = vadd.f32 %v2748_v12, %v3928_v50 }
 0x161   :  { %v1955_v40 = vadd.f32 %v1954_v16, %v1695_v15  ;;  %v627_v41 = vadd.f32 %v3928_v50, %v626_v29  ;;  %v1277_v44 = vadd.f32 %v3928_v50, %v1276_v33  ;;  %v2105_v42 = vadd.f32 %v2104_v24, %v1825_v25 }
 0x162   :  { %v1828_v54 = vmax.f32 %v1282_v26, 0.0  ;;  %v1698_v4 = vmax.f32 %v632_v37, 0.0 }
 0x163   :  { %v1697_v47 = vmax.f32 %v627_v41, 0.0  ;;  %v1956_v46 = vadd.f32 %v1955_v40, %v1696_v23  ;;  %v2751_v49 = vpop.f32.mrb[54].mxu0  ;;  %v1827_v53 = vmax.f32 %v1277_v44, 0.0  ;;  %v2946_v55 = vpop.f32.mrb[54].mxu1  ;;  %v2106_v63 = vadd.f32 %v2105_v42, %v1826_v32 }
 0x164   :  { %v642_v52 = vadd.f32 %v2751_v49, %v3928_v50  ;;  %v636_v60 = vpop.f32.mrb[55].mxu0  ;;  %v1292_v0 = vadd.f32 %v2946_v55, %v3928_v50  ;;  %v1286_v2 = vpop.f32.mrb[55].mxu1 }
 0x165   :  { %v1957_v5 = vadd.f32 %v1956_v46, %v1697_v47  ;;  %v637_v6 = vadd.f32 %v3928_v50, %v636_v60  ;;  %v1287_v8 = vadd.f32 %v3928_v50, %v1286_v2  ;;  %v2107_v15 = vadd.f32 %v2106_v63, %v1827_v53 }
 0x166   :  { %v1700_v29 = vmax.f32 %v642_v52, 0.0  ;;  %v1830_v33 = vmax.f32 %v1292_v0, 0.0 }
 0x167   :  { %v1699_v16 = vmax.f32 %v637_v6, 0.0  ;;  %v1958_v12 = vadd.f32 %v1957_v5, %v1698_v4  ;;  %v2754_v25 = vpop.f32.mrb[56].mxu0  ;;  %v1829_v18 = vmax.f32 %v1287_v8, 0.0  ;;  %v2949_v23 = vpop.f32.mrb[56].mxu1  ;;  %v2108_v26 = vadd.f32 %v2107_v15, %v1828_v54 }
 0x168   :  { %v646_v24 = vpop.f32.mrb[57].mxu0  ;;  %v1302_v32 = vadd.f32 %v2949_v23, %v3928_v50  ;;  %v1296_v40 = vpop.f32.mrb[57].mxu1  ;;  %v652_v37 = vadd.f32 %v2754_v25, %v3928_v50 }
 0x169   :  { %v1959_v41 = vadd.f32 %v1958_v12, %v1699_v16  ;;  %v647_v44 = vadd.f32 %v3928_v50, %v646_v24  ;;  %v1297_v42 = vadd.f32 %v3928_v50, %v1296_v40  ;;  %v2109_v47 = vadd.f32 %v2108_v26, %v1829_v18 }
 0x16a   :  { %v1832_v54 = vmax.f32 %v1302_v32, 0.0  ;;  %v1702_v5 = vmax.f32 %v652_v37, 0.0  ;;  %v1932_v16 = vrot.slane %v4175_v38, 4 }
 0x16b   :  { %v1701_v46 = vmax.f32 %v647_v44, 0.0  ;;  %v1960_v49 = vadd.f32 %v1959_v41, %v1700_v29  ;;  %v2757_v53 = vpop.f32.mrb[58].mxu0  ;;  %v1831_v55 = vmax.f32 %v1297_v42, 0.0  ;;  %v2952_v60 = vpop.f32.mrb[58].mxu1  ;;  %v2110_v0 = vadd.f32 %v2109_v47, %v1830_v33 }
 0x16c   :  { %v662_v52 = vadd.f32 %v2757_v53, %v3928_v50  ;;  %v656_v63 = vpop.f32.mrb[59].mxu0  ;;  %v1312_v2 = vadd.f32 %v2952_v60, %v3928_v50  ;;  %v1306_v4 = vpop.f32.mrb[59].mxu1  ;;  %v2216_v60 = vld [vmem:[%s4505_s3 + $0x58] sm:$0xff] }
 0x16d   :  { %v1961_v6 = vadd.f32 %v1960_v49, %v1701_v46  ;;  %v657_v8 = vadd.f32 %v3928_v50, %v656_v63  ;;  %v1307_v15 = vadd.f32 %v3928_v50, %v1306_v4  ;;  %v2111_v12 = vadd.f32 %v2110_v0, %v1831_v55  ;;  %v2215_v55 = vld [vmem:[%s4505_s3 + $0x50] sm:$0xff] }
 0x16e   :  { %v1704_v26 = vmax.f32 %v662_v52, 0.0  ;;  %v1834_v33 = vmax.f32 %v1312_v2, 0.0  ;;  %v1933_v49 = vadd.f32 %v1932_v16, %v4175_v38  ;;  %v3135_v4 = vpack.c.bf16 %v2216_v60, %v2215_v55 }
 0x16f   :  { %v1703_v25 = vmax.f32 %v657_v8, 0.0  ;;  %v1962_v18 = vadd.f32 %v1961_v6, %v1702_v5  ;;  %v2760_v23 = vpop.f32.mrb[60].mxu0  ;;  %v1833_v29 = vmax.f32 %v1307_v15, 0.0  ;;  %v2955_v24 = vpop.f32.mrb[60].mxu1  ;;  %v2112_v40 = vadd.f32 %v2111_v12, %v1832_v54  ;;  %v4252_v15 = vld [vmem:[%s4504_s2] ss:$0 sm:$0xff] }
 0x170   :  { %v666_v32 = vpop.f32.mrb[61].mxu0  ;;  %v1322_v41 = vadd.f32 %v2955_v24, %v3928_v50  ;;  %v1316_v37 = vpop.f32.mrb[61].mxu1  ;;  %v672_v42 = vadd.f32 %v2760_v23, %v3928_v50  ;;  %3136 = vmatpush3.bf16.msra.mxu1 %v3135_v4  ;;  %v1934_v24 = vrot.slane %v1933_v49, 2 }
 0x171   :  { %v1963_v44 = vadd.f32 %v1962_v18, %v1703_v25  ;;  %v667_v47 = vadd.f32 %v3928_v50, %v666_v32  ;;  %v1317_v46 = vadd.f32 %v3928_v50, %v1316_v37  ;;  %v2113_v53 = vadd.f32 %v2112_v40, %v1833_v29  ;;  %3137 = vmatprep.subr.bf16.mxu1 %v3193_v20 }
 0x172   :  { %v1836_v8 = vmax.f32 %v1322_v41, 0.0  ;;  %v1706_v25 = vmax.f32 %v672_v42, 0.0 }
 0x173   :  { %v1705_v52 = vmax.f32 %v667_v47, 0.0  ;;  %v1964_v63 = vadd.f32 %v1963_v44, %v1704_v26  ;;  %v2763_v54 = vpop.f32.mrb[62].mxu0  ;;  %v1835_v0 = vmax.f32 %v1317_v46, 0.0  ;;  %v2958_v2 = vpop.f32.mrb[62].mxu1  ;;  %v2114_v38 = vadd.f32 %v2113_v53, %v1834_v33 }
 0x174   :  { %v682_v5 = vadd.f32 %v2763_v54, %v3928_v50  ;;  %v676_v6 = vpop.f32.mrb[63].mxu0  ;;  %v1332_v16 = vadd.f32 %v4252_v15, %v2958_v2  ;;  %v1326_v12 = vpop.f32.mrb[63].mxu1 }
 0x175   :  { %v1965_v18 = vadd.f32 %v1964_v63, %v1705_v52  ;;  %v677_v23 = vadd.f32 %v4252_v15, %v676_v6  ;;  %v1327_v29 = vadd.f32 %v4252_v15, %v1326_v12  ;;  %v2115_v50 = vadd.f32 %v2114_v38, %v1835_v0 }
 0x176   :  { %v1838_v26 = vmax.f32 %v1332_v16, 0.0  ;;  %v1708_v44 = vmax.f32 %v682_v5, 0.0  ;;  %v1935_v0 = vadd.f32 %v1934_v24, %v1933_v49 }
 0x177   :  { %v1707_v32 = vmax.f32 %v677_v23, 0.0  ;;  %v1966_v33 = vadd.f32 %v1965_v18, %v1706_v25  ;;  %v2766_v40 = vpop.f32.mrb[64].mxu0  ;;  %v1837_v41 = vmax.f32 %v1327_v29, 0.0  ;;  %v2961_v37 = vpop.f32.mrb[64].mxu1  ;;  %v4259_v46 = vadd.f32 %v2115_v50, %v1836_v8 }
 0x178   :  { %v692_v47 = vadd.f32 %v4252_v15, %v2766_v40  ;;  %v686_v42 = vpop.f32.mrb[65].mxu0  ;;  %v1342_v53 = vadd.f32 %v4252_v15, %v2961_v37  ;;  %v1336_v55 = vpop.f32.mrb[65].mxu1 }
 0x179   :  { %v1967_v60 = vadd.f32 %v1966_v33, %v1707_v32  ;;  %v687_v52 = vadd.f32 %v4252_v15, %v686_v42  ;;  %v2123_v63 = vadd.f32 %v1838_v26, %v1837_v41  ;;  %v1337_v54 = vadd.f32 %v4252_v15, %v1336_v55 }
 0x17a   :  { %v1710_v2 = vmax.f32 %v692_v47, 0.0  ;;  %v1840_v5 = vmax.f32 %v1342_v53, 0.0  ;;  %v1936_v33 = vrot.slane %v1935_v0, 1 }
 0x17b   :  { %v1968_v4 = vadd.f32 %v1967_v60, %v1708_v44  ;;  %v1709_v6 = vmax.f32 %v687_v52, 0.0  ;;  %v2769_v38 = vpop.f32.mrb[66].mxu0  ;;  %v1839_v16 = vmax.f32 %v1337_v54, 0.0  ;;  %v2964_v12 = vpop.f32.mrb[66].mxu1 }
 0x17c   :  { %v702_v8 = vadd.f32 %v4252_v15, %v2769_v38  ;;  %v696_v25 = vpop.f32.mrb[67].mxu0  ;;  %v1352_v18 = vadd.f32 %v4252_v15, %v2964_v12  ;;  %v1346_v23 = vpop.f32.mrb[67].mxu1 }
 0x17d   :  { %v1969_v29 = vrot.slane %v1968_v4, 4  ;;  %v1975_v50 = vadd.f32 %v1710_v2, %v1709_v6  ;;  %v697_v26 = vadd.f32 %v4252_v15, %v696_v25  ;;  %v2124_v32 = vadd.f32 %v2123_v63, %v1839_v16 }
 0x17e   :  { %v1347_v49 = vadd.f32 %v4252_v15, %v1346_v23  ;;  %v1712_v40 = vmax.f32 %v702_v8, 0.0  ;;  %v1842_v55 = vmax.f32 %v1352_v18, 0.0 }
 0x17f   :  { %v1970_v24 = vadd.f32 %v1969_v29, %v1968_v4  ;;  %v1711_v41 = vmax.f32 %v697_v26, 0.0  ;;  %v2772_v37 = vpop.f32.mrb[68].mxu0  ;;  %v2125_v44 = vadd.f32 %v2124_v32, %v1840_v5  ;;  %v2967_v47 = vpop.f32.mrb[68].mxu1  ;;  %v1937_v4 = vadd.f32 %v1936_v33, %v1935_v0 }
 0x180   :  { %v712_v42 = vadd.f32 %v4252_v15, %v2772_v37  ;;  %v706_v53 = vpop.f32.mrb[69].mxu0  ;;  %v1841_v60 = vmax.f32 %v1347_v49, 0.0  ;;  %v1362_v52 = vadd.f32 %v4252_v15, %v2967_v47  ;;  %v1356_v54 = vpop.f32.mrb[69].mxu1 }
 0x181   :  { %v1971_v2 = vrot.slane %v1970_v24, 2  ;;  %v1976_v6 = vadd.f32 %v1975_v50, %v1711_v41  ;;  %v707_v63 = vadd.f32 %v4252_v15, %v706_v53  ;;  %v1357_v38 = vadd.f32 %v4252_v15, %v1356_v54 }
 0x182   :  { %v1714_v16 = vmax.f32 %v712_v42, 0.0  ;;  %v2126_v12 = vadd.f32 %v2125_v44, %v1841_v60  ;;  %v1844_v49 = vmax.f32 %v1362_v52, 0.0 }
 0x183   :  { %v1972_v8 = vadd.f32 %v1971_v2, %v1970_v24  ;;  %v1713_v5 = vmax.f32 %v707_v63, 0.0  ;;  %v1977_v25 = vadd.f32 %v1976_v6, %v1712_v40  ;;  %v2775_v23 = vpop.f32.mrb[70].mxu0  ;;  %v1843_v29 = vmax.f32 %v1357_v38, 0.0  ;;  %v2970_v26 = vpop.f32.mrb[70].mxu1 }
 0x184   :  { %v722_v18 = vadd.f32 %v4252_v15, %v2775_v23  ;;  %v716_v32 = vpop.f32.mrb[71].mxu0  ;;  %v2127_v37 = vadd.f32 %v2126_v12, %v1842_v55  ;;  %v1372_v50 = vadd.f32 %v4252_v15, %v2970_v26  ;;  %v1366_v41 = vpop.f32.mrb[71].mxu1  ;;  %v2197_v24 = vmul.f32 0.00390625, %v1937_v4 }
 0x185   :  { %v1973_v47 = vrot.slane %v1972_v8, 1  ;;  %v1978_v53 = vadd.f32 %v1977_v25, %v1713_v5  ;;  %v717_v0 = vadd.f32 %v4252_v15, %v716_v32  ;;  %v1367_v33 = vadd.f32 %v4252_v15, %v1366_v41 }
 0x186   :  { %v1716_v40 = vmax.f32 %v722_v18, 0.0  ;;  %v2128_v44 = vadd.f32 %v2127_v37, %v1843_v29  ;;  %v1846_v38 = vmax.f32 %v1372_v50, 0.0 }
 0x187   :  { %v1974_v42 = vadd.f32 %v1973_v47, %v1972_v8  ;;  %v1715_v60 = vmax.f32 %v717_v0, 0.0  ;;  %v1979_v54 = vadd.f32 %v1978_v53, %v1714_v16  ;;  %v2778_v2 = vpop.f32.mrb[72].mxu0  ;;  %v1845_v6 = vmax.f32 %v1367_v33, 0.0  ;;  %v2973_v52 = vpop.f32.mrb[72].mxu1 }
 0x188   :  { %v732_v55 = vadd.f32 %v4252_v15, %v2778_v2  ;;  %v726_v63 = vpop.f32.mrb[73].mxu0  ;;  %v2129_v12 = vadd.f32 %v2128_v44, %v1844_v49  ;;  %v1382_v5 = vadd.f32 %v4252_v15, %v2973_v52  ;;  %v1376_v25 = vpop.f32.mrb[73].mxu1 }
 0x189   :  { %v2198_v23 = vmul.f32 0.00390625, %v1974_v42  ;;  %v1980_v26 = vadd.f32 %v1979_v54, %v1715_v60  ;;  %v727_v4 = vadd.f32 %v4252_v15, %v726_v63  ;;  %v1377_v29 = vadd.f32 %v4252_v15, %v1376_v25 }
 0x18a   :  { %v2130_v8 = vadd.f32 %v2129_v12, %v1845_v6  ;;  %v1718_v50 = vmax.f32 %v732_v55, 0.0  ;;  %v1848_v53 = vmax.f32 %v1382_v5, 0.0 }
 0x18b   :  { %v4281_v16 = vsel %vm2236_vm0, %v2198_v23, %v2197_v24  ;;  %v1717_v18 = vmax.f32 %v727_v4, 0.0  ;;  %v1981_v32 = vadd.f32 %v1980_v26, %v1716_v40  ;;  %v2781_v37 = vpop.f32.mrb[74].mxu0  ;;  %v1847_v41 = vmax.f32 %v1377_v29, 0.0  ;;  %v2976_v47 = vpop.f32.mrb[74].mxu1 }
 0x18c   :  { %v736_v49 = vpop.f32.mrb[75].mxu0  ;;  %v2131_v0 = vadd.f32 %v2130_v8, %v1846_v38  ;;  %v1392_v33 = vadd.f32 %v4252_v15, %v2976_v47  ;;  %v1386_v44 = vpop.f32.mrb[75].mxu1  ;;  %v742_v60 = vadd.f32 %v4252_v15, %v2781_v37 }
 0x18d   :  { %v1982_v42 = vadd.f32 %v1981_v32, %v1717_v18  ;;  %v737_v54 = vadd.f32 %v4252_v15, %v736_v49  ;;  %v1387_v24 = vadd.f32 %v4252_v15, %v1386_v44 }
 0x18e   :  { %v2132_v2 = vadd.f32 %v2131_v0, %v1847_v41  ;;  %v1850_v38 = vmax.f32 %v1392_v33, 0.0  ;;  %v1720_v4 = vmax.f32 %v742_v60, 0.0 }
 0x18f   :  { %v1719_v6 = vmax.f32 %v737_v54, 0.0  ;;  %v1983_v40 = vadd.f32 %v1982_v42, %v1718_v50  ;;  %v2784_v52 = vpop.f32.mrb[76].mxu0  ;;  %v1849_v63 = vmax.f32 %v1387_v24, 0.0  ;;  %v2979_v12 = vpop.f32.mrb[76].mxu1 }
 0x190   :  { %v752_v55 = vadd.f32 %v4252_v15, %v2784_v52  ;;  %v746_v5 = vpop.f32.mrb[77].mxu0  ;;  %v2133_v25 = vadd.f32 %v2132_v2, %v1848_v53  ;;  %v1402_v23 = vadd.f32 %v4252_v15, %v2979_v12  ;;  %v1396_v26 = vpop.f32.mrb[77].mxu1 }
 0x191   :  { %v1984_v29 = vadd.f32 %v1983_v40, %v1719_v6  ;;  %v747_v8 = vadd.f32 %v4252_v15, %v746_v5  ;;  %v1397_v18 = vadd.f32 %v4252_v15, %v1396_v26 }
 0x192   :  { %v2134_v32 = vadd.f32 %v2133_v25, %v1849_v63  ;;  %v1722_v0 = vmax.f32 %v752_v55, 0.0  ;;  %v1852_v42 = vmax.f32 %v1402_v23, 0.0 }
 0x193   :  { %v1721_v37 = vmax.f32 %v747_v8, 0.0  ;;  %v1985_v41 = vadd.f32 %v1984_v29, %v1720_v4  ;;  %v2787_v47 = vpop.f32.mrb[78].mxu0  ;;  %v1851_v50 = vmax.f32 %v1397_v18, 0.0  ;;  %v2982_v49 = vpop.f32.mrb[78].mxu1 }
 0x194   :  { %v756_v44 = vpop.f32.mrb[79].mxu0  ;;  %v2135_v33 = vadd.f32 %v2134_v32, %v1850_v38  ;;  %v1412_v53 = vadd.f32 %v4252_v15, %v2982_v49  ;;  %v1406_v54 = vpop.f32.mrb[79].mxu1  ;;  %v762_v60 = vadd.f32 %v4252_v15, %v2787_v47 }
 0x195   :  { %v1986_v24 = vadd.f32 %v1985_v41, %v1721_v37  ;;  %v757_v2 = vadd.f32 %v4252_v15, %v756_v44  ;;  %v1407_v6 = vadd.f32 %v4252_v15, %v1406_v54 }
 0x196   :  { %v2136_v40 = vadd.f32 %v2135_v33, %v1851_v50  ;;  %v1854_v38 = vmax.f32 %v1412_v53, 0.0  ;;  %v1724_v8 = vmax.f32 %v762_v60, 0.0 }
 0x197   :  { %v1723_v52 = vmax.f32 %v757_v2, 0.0  ;;  %v1987_v63 = vadd.f32 %v1986_v24, %v1722_v0  ;;  %v2790_v12 = vpop.f32.mrb[80].mxu0  ;;  %v1853_v5 = vmax.f32 %v1407_v6, 0.0  ;;  %v2985_v25 = vpop.f32.mrb[80].mxu1 }
 0x198   :  { %v772_v55 = vadd.f32 %v4252_v15, %v2790_v12  ;;  %v766_v23 = vpop.f32.mrb[81].mxu0  ;;  %v2137_v26 = vadd.f32 %v2136_v40, %v1852_v42  ;;  %v1422_v4 = vadd.f32 %v4252_v15, %v2985_v25  ;;  %v1416_v29 = vpop.f32.mrb[81].mxu1 }
 0x199   :  { %v1988_v18 = vadd.f32 %v1987_v63, %v1723_v52  ;;  %v767_v32 = vadd.f32 %v4252_v15, %v766_v23  ;;  %v1417_v37 = vadd.f32 %v4252_v15, %v1416_v29 }
 0x19a   :  { %v2138_v41 = vadd.f32 %v2137_v26, %v1853_v5  ;;  %v1726_v33 = vmax.f32 %v772_v55, 0.0  ;;  %v1856_v24 = vmax.f32 %v1422_v4, 0.0 }
 0x19b   :  { %v1725_v47 = vmax.f32 %v767_v32, 0.0  ;;  %v1989_v50 = vadd.f32 %v1988_v18, %v1724_v8  ;;  %v2793_v49 = vpop.f32.mrb[82].mxu0  ;;  %v1855_v0 = vmax.f32 %v1417_v37, 0.0  ;;  %v2988_v44 = vpop.f32.mrb[82].mxu1 }
 0x19c   :  { %v776_v54 = vpop.f32.mrb[83].mxu0  ;;  %v2139_v53 = vadd.f32 %v2138_v41, %v1854_v38  ;;  %v1432_v42 = vadd.f32 %v4252_v15, %v2988_v44  ;;  %v1426_v2 = vpop.f32.mrb[83].mxu1  ;;  %v782_v60 = vadd.f32 %v4252_v15, %v2793_v49 }
 0x19d   :  { %v1990_v6 = vadd.f32 %v1989_v50, %v1725_v47  ;;  %v777_v40 = vadd.f32 %v4252_v15, %v776_v54  ;;  %v1427_v52 = vadd.f32 %v4252_v15, %v1426_v2 }
 0x19e   :  { %v2140_v63 = vadd.f32 %v2139_v53, %v1855_v0  ;;  %v1858_v38 = vmax.f32 %v1432_v42, 0.0  ;;  %v1728_v32 = vmax.f32 %v782_v60, 0.0 }
 0x19f   :  { %v1727_v12 = vmax.f32 %v777_v40, 0.0  ;;  %v1991_v5 = vadd.f32 %v1990_v6, %v1726_v33  ;;  %v2796_v25 = vpop.f32.mrb[84].mxu0  ;;  %v1857_v23 = vmax.f32 %v1427_v52, 0.0  ;;  %v2991_v26 = vpop.f32.mrb[84].mxu1 }
 0x1a0   :  { %v792_v55 = vadd.f32 %v4252_v15, %v2796_v25  ;;  %v786_v4 = vpop.f32.mrb[85].mxu0  ;;  %v2141_v29 = vadd.f32 %v2140_v63, %v1856_v24  ;;  %v1442_v8 = vadd.f32 %v4252_v15, %v2991_v26  ;;  %v1436_v18 = vpop.f32.mrb[85].mxu1  ;;  %v2218_v25 = vld [vmem:[%s4505_s3 + $0x68] sm:$0xff] }
 0x1a1   :  { %v1992_v37 = vadd.f32 %v1991_v5, %v1727_v12  ;;  %v787_v41 = vadd.f32 %v4252_v15, %v786_v4  ;;  %v1437_v47 = vadd.f32 %v4252_v15, %v1436_v18  ;;  %v2217_v5 = vld [vmem:[%s4505_s3 + $0x60] sm:$0xff] }
 0x1a2   :  { %v2142_v50 = vadd.f32 %v2141_v29, %v1857_v23  ;;  %v1730_v53 = vmax.f32 %v792_v55, 0.0  ;;  %v1860_v6 = vmax.f32 %v1442_v8, 0.0  ;;  %v2219_v23 = vld [vmem:[%s4505_s3 + $0x70] sm:$0xff]  ;;  %v3138_v4 = vpack.c.bf16 %v2218_v25, %v2217_v5 }
 0x1a3   :  { %v1729_v49 = vmax.f32 %v787_v41, 0.0  ;;  %v1993_v0 = vadd.f32 %v1992_v37, %v1728_v32  ;;  %v2799_v44 = vpop.f32.mrb[86].mxu0  ;;  %v1859_v33 = vmax.f32 %v1437_v47, 0.0  ;;  %v2994_v54 = vpop.f32.mrb[86].mxu1 }
 0x1a4   :  { %v796_v2 = vpop.f32.mrb[87].mxu0  ;;  %v2143_v42 = vadd.f32 %v2142_v50, %v1858_v38  ;;  %v1452_v24 = vadd.f32 %v4252_v15, %v2994_v54  ;;  %v1446_v40 = vpop.f32.mrb[87].mxu1  ;;  %v802_v60 = vadd.f32 %v4252_v15, %v2799_v44  ;;  %v2220_v38 = vld [vmem:[%s4505_s3 + $0x78] sm:$0xff]  ;;  %3139 = vmatpush3.bf16.msra.mxu1 %v3138_v4 }
 0x1a5   :  { %v1994_v52 = vadd.f32 %v1993_v0, %v1729_v49  ;;  %v797_v63 = vadd.f32 %v4252_v15, %v796_v2  ;;  %v1447_v12 = vadd.f32 %v4252_v15, %v1446_v40  ;;  %v3141_v41 = vpack.c.bf16 %v2220_v38, %v2219_v23  ;;  %3140 = vmatprep.subr.bf16.mxu1 %v3193_v20 }
 0x1a6   :  { %v2144_v26 = vadd.f32 %v2143_v42, %v1859_v33  ;;  %v1862_v55 = vmax.f32 %v1452_v24, 0.0  ;;  %v1732_v33 = vmax.f32 %v802_v60, 0.0 }
 0x1a7   :  { %v1731_v29 = vmax.f32 %v797_v63, 0.0  ;;  %v1995_v8 = vadd.f32 %v1994_v52, %v1730_v53  ;;  %v2802_v18 = vpop.f32.mrb[88].mxu0  ;;  %v1861_v32 = vmax.f32 %v1447_v12, 0.0  ;;  %v2997_v37 = vpop.f32.mrb[88].mxu1  ;;  %v3195_v53 = vmov 0.0  }
 0x1a8   :  { %v812_v47 = vadd.f32 %v4252_v15, %v2802_v18  ;;  %v806_v50 = vpop.f32.mrb[89].mxu0  ;;  %v2145_v49 = vadd.f32 %v2144_v26, %v1860_v6  ;;  %v1462_v0 = vadd.f32 %v4252_v15, %v2997_v37  ;;  %v1456_v44 = vpop.f32.mrb[89].mxu1  ;;  %3084 = vmatprep.mubr.msk.f32.mxu1 %vm3194_vm1, %v3195_v53  ;;  %3142 = vmatpush3.bf16.msra.mxu1 %v3141_v41 }
 0x1a9   :  { %v1996_v54 = vadd.f32 %v1995_v8, %v1731_v29  ;;  %v807_v2 = vadd.f32 %v4252_v15, %v806_v50  ;;  %v1457_v42 = vadd.f32 %v4252_v15, %v1456_v44 }
 0x1aa   :  { %v2146_v24 = vadd.f32 %v2145_v49, %v1861_v32  ;;  %v1864_v60 = vmax.f32 %v1462_v0, 0.0  ;;  %v1734_v38 = vmax.f32 %v812_v47, 0.0 }
 0x1ab   :  { %v1733_v40 = vmax.f32 %v807_v2, 0.0  ;;  %v1997_v52 = vadd.f32 %v1996_v54, %v1732_v33  ;;  %v2805_v63 = vpop.f32.mrb[90].mxu0  ;;  %v1863_v6 = vmax.f32 %v1457_v42, 0.0  ;;  %v3000_v12 = vpop.f32.mrb[90].mxu1 }
 0x1ac   :  { %v822_v5 = vadd.f32 %v4252_v15, %v2805_v63  ;;  %v816_v25 = vpop.f32.mrb[91].mxu0  ;;  %v2147_v23 = vadd.f32 %v2146_v24, %v1862_v55  ;;  %v1472_v26 = vadd.f32 %v4252_v15, %v3000_v12  ;;  %v1466_v4 = vpop.f32.mrb[91].mxu1 }
 0x1ad   :  { %v1998_v20 = vadd.f32 %v1997_v52, %v1733_v40  ;;  %v817_v29 = vadd.f32 %v4252_v15, %v816_v25  ;;  %v1467_v8 = vadd.f32 %v4252_v15, %v1466_v4 }
 0x1ae   :  { %v2148_v18 = vadd.f32 %v2147_v23, %v1863_v6  ;;  %v1736_v33 = vmax.f32 %v822_v5, 0.0  ;;  %v1866_v0 = vmax.f32 %v1472_v26, 0.0 }
 0x1af   :  { %v1735_v32 = vmax.f32 %v817_v29, 0.0  ;;  %v1999_v37 = vadd.f32 %v1998_v20, %v1734_v38  ;;  %v2808_v50 = vpop.f32.mrb[92].mxu0  ;;  %v1865_v49 = vmax.f32 %v1467_v8, 0.0  ;;  %v3003_v44 = vpop.f32.mrb[92].mxu1 }
 0x1b0   :  { %v826_v54 = vpop.f32.mrb[93].mxu0  ;;  %v2149_v55 = vadd.f32 %v2148_v18, %v1864_v60  ;;  %v1482_v2 = vadd.f32 %v4252_v15, %v3003_v44  ;;  %v1476_v42 = vpop.f32.mrb[93].mxu1  ;;  %v832_v47 = vadd.f32 %v4252_v15, %v2808_v50 }
 0x1b1   :  { %v2000_v41 = vadd.f32 %v1999_v37, %v1735_v32  ;;  %v827_v53 = vadd.f32 %v4252_v15, %v826_v54  ;;  %v1477_v24 = vadd.f32 %v4252_v15, %v1476_v42 }
 0x1b2   :  { %v2150_v40 = vadd.f32 %v2149_v55, %v1865_v49  ;;  %v1868_v60 = vmax.f32 %v1482_v2, 0.0  ;;  %v1738_v20 = vmax.f32 %v832_v47, 0.0 }
 0x1b3   :  { %v1737_v52 = vmax.f32 %v827_v53, 0.0  ;;  %v2001_v63 = vadd.f32 %v2000_v41, %v1736_v33  ;;  %v2811_v6 = vpop.f32.mrb[94].mxu0  ;;  %v1867_v12 = vmax.f32 %v1477_v24, 0.0  ;;  %v3006_v25 = vpop.f32.mrb[94].mxu1 }
 0x1b4   :  { %v842_v5 = vadd.f32 %v4252_v15, %v2811_v6  ;;  %v836_v23 = vpop.f32.mrb[95].mxu0  ;;  %v2151_v26 = vadd.f32 %v2150_v40, %v1866_v0  ;;  %v1492_v4 = vadd.f32 %v4252_v15, %v3006_v25  ;;  %v1486_v38 = vpop.f32.mrb[95].mxu1 }
 0x1b5   :  { %v2002_v29 = vadd.f32 %v2001_v63, %v1737_v52  ;;  %v837_v8 = vadd.f32 %v4252_v15, %v836_v23  ;;  %v1487_v18 = vadd.f32 %v4252_v15, %v1486_v38 }
 0x1b6   :  { %v2152_v32 = vadd.f32 %v2151_v26, %v1867_v12  ;;  %v1870_v37 = vmax.f32 %v1492_v4, 0.0  ;;  %v1740_v55 = vmax.f32 %v842_v5, 0.0 }
 0x1b7   :  { %v1739_v50 = vmax.f32 %v837_v8, 0.0  ;;  %v2003_v49 = vadd.f32 %v2002_v29, %v1738_v20  ;;  %v2814_v44 = vpop.f32.mrb[96].mxu0  ;;  %v1869_v33 = vmax.f32 %v1487_v18, 0.0  ;;  %v3009_v54 = vpop.f32.mrb[96].mxu1 }
 0x1b8   :  { %v852_v2 = vadd.f32 %v4252_v15, %v2814_v44  ;;  %v846_v0 = vpop.f32.mrb[97].mxu0  ;;  %v4341_v42 = vadd.f32 %v2152_v32, %v1868_v60  ;;  %v1502_v41 = vadd.f32 %v4252_v15, %v3009_v54  ;;  %v1496_v47 = vpop.f32.mrb[97].mxu1 }
 0x1b9   :  { %v2004_v53 = vadd.f32 %v2003_v49, %v1739_v50  ;;  %v847_v24 = vadd.f32 %v4252_v15, %v846_v0  ;;  %v2160_v40 = vadd.f32 %v1870_v37, %v1869_v33  ;;  %v1497_v52 = vadd.f32 %v4252_v15, %v1496_v47 }
 0x1ba   :  { %v1742_v63 = vmax.f32 %v852_v2, 0.0  ;;  %v1872_v23 = vmax.f32 %v1502_v41, 0.0 }
 0x1bb   :  { %v2005_v6 = vadd.f32 %v2004_v53, %v1740_v55  ;;  %v1741_v12 = vmax.f32 %v847_v24, 0.0  ;;  %v2817_v25 = vpop.f32.mrb[98].mxu0  ;;  %v1871_v5 = vmax.f32 %v1497_v52, 0.0  ;;  %v3012_v26 = vpop.f32.mrb[98].mxu1 }
 0x1bc   :  { %v862_v4 = vadd.f32 %v4252_v15, %v2817_v25  ;;  %v856_v60 = vpop.f32.mrb[99].mxu0  ;;  %v1512_v38 = vadd.f32 %v4252_v15, %v3012_v26  ;;  %v1506_v20 = vpop.f32.mrb[99].mxu1 }
 0x1bd   :  { %v2006_v29 = vrot.slane %v2005_v6, 4  ;;  %v2012_v8 = vadd.f32 %v1742_v63, %v1741_v12  ;;  %v857_v18 = vadd.f32 %v4252_v15, %v856_v60  ;;  %v2161_v32 = vadd.f32 %v2160_v40, %v1871_v5 }
 0x1be   :  { %v1507_v37 = vadd.f32 %v4252_v15, %v1506_v20  ;;  %v1744_v49 = vmax.f32 %v862_v4, 0.0  ;;  %v1874_v41 = vmax.f32 %v1512_v38, 0.0 }
 0x1bf   :  { %v2007_v50 = vadd.f32 %v2006_v29, %v2005_v6  ;;  %v1743_v44 = vmax.f32 %v857_v18, 0.0  ;;  %v2820_v33 = vpop.f32.mrb[100].mxu0  ;;  %v2162_v54 = vadd.f32 %v2161_v32, %v1872_v23  ;;  %v3015_v55 = vpop.f32.mrb[100].mxu1 }
 0x1c0   :  { %v872_v2 = vadd.f32 %v4252_v15, %v2820_v33  ;;  %v866_v0 = vpop.f32.mrb[101].mxu0  ;;  %v1873_v47 = vmax.f32 %v1507_v37, 0.0  ;;  %v1522_v53 = vadd.f32 %v4252_v15, %v3015_v55  ;;  %v1516_v24 = vpop.f32.mrb[101].mxu1 }
 0x1c1   :  { %v2008_v52 = vrot.slane %v2007_v50, 2  ;;  %v2013_v63 = vadd.f32 %v2012_v8, %v1743_v44  ;;  %v867_v40 = vadd.f32 %v4252_v15, %v866_v0  ;;  %v1517_v12 = vadd.f32 %v4252_v15, %v1516_v24 }
 0x1c2   :  { %v1746_v6 = vmax.f32 %v872_v2, 0.0  ;;  %v2163_v25 = vadd.f32 %v2162_v54, %v1873_v47  ;;  %v1876_v18 = vmax.f32 %v1522_v53, 0.0 }
 0x1c3   :  { %v2009_v5 = vadd.f32 %v2008_v52, %v2007_v50  ;;  %v1745_v26 = vmax.f32 %v867_v40, 0.0  ;;  %v2014_v23 = vadd.f32 %v2013_v63, %v1744_v49  ;;  %v2823_v4 = vpop.f32.mrb[102].mxu0  ;;  %v1875_v60 = vmax.f32 %v1517_v12, 0.0  ;;  %v3018_v20 = vpop.f32.mrb[102].mxu1 }
 0x1c4   :  { %v882_v38 = vadd.f32 %v4252_v15, %v2823_v4  ;;  %v876_v29 = vpop.f32.mrb[103].mxu0  ;;  %v2164_v32 = vadd.f32 %v2163_v25, %v1874_v41  ;;  %v1532_v37 = vadd.f32 %v4252_v15, %v3018_v20  ;;  %v1526_v8 = vpop.f32.mrb[103].mxu1 }
 0x1c5   :  { %v2010_v44 = vrot.slane %v2009_v5, 1  ;;  %v2015_v33 = vadd.f32 %v2014_v23, %v1745_v26  ;;  %v877_v55 = vadd.f32 %v4252_v15, %v876_v29  ;;  %v1527_v54 = vadd.f32 %v4252_v15, %v1526_v8 }
 0x1c6   :  { %v1748_v50 = vmax.f32 %v882_v38, 0.0  ;;  %v2165_v49 = vadd.f32 %v2164_v32, %v1875_v60  ;;  %v1878_v40 = vmax.f32 %v1532_v37, 0.0 }
 0x1c7   :  { %v2011_v2 = vadd.f32 %v2010_v44, %v2009_v5  ;;  %v1747_v0 = vmax.f32 %v877_v55, 0.0  ;;  %v2016_v47 = vadd.f32 %v2015_v33, %v1746_v6  ;;  %v2826_v24 = vpop.f32.mrb[104].mxu0  ;;  %v1877_v52 = vmax.f32 %v1527_v54, 0.0  ;;  %v3021_v63 = vpop.f32.mrb[104].mxu1 }
 0x1c8   :  { %v892_v41 = vadd.f32 %v4252_v15, %v2826_v24  ;;  %v886_v53 = vpop.f32.mrb[105].mxu0  ;;  %v2166_v12 = vadd.f32 %v2165_v49, %v1876_v18  ;;  %v1542_v25 = vadd.f32 %v4252_v15, %v3021_v63  ;;  %v1536_v26 = vpop.f32.mrb[105].mxu1 }
 0x1c9   :  { %v2199_v23 = vmul.f32 0.00390625, %v2011_v2  ;;  %v2017_v4 = vadd.f32 %v2016_v47, %v1747_v0  ;;  %v887_v20 = vadd.f32 %v4252_v15, %v886_v53  ;;  %v1537_v60 = vadd.f32 %v4252_v15, %v1536_v26 }
 0x1ca   :  { %v2167_v5 = vadd.f32 %v2166_v12, %v1877_v52  ;;  %v1880_v33 = vmax.f32 %v1542_v25, 0.0  ;;  %v1750_v2 = vmax.f32 %v892_v41, 0.0 }
 0x1cb   :  { %v4364_v6 = vsel %vm2238_vm2, %v2199_v23, %v4281_v16  ;;  %v1749_v38 = vmax.f32 %v887_v20, 0.0  ;;  %v2018_v29 = vadd.f32 %v2017_v4, %v1748_v50  ;;  %v2829_v32 = vpop.f32.mrb[106].mxu0  ;;  %v1879_v8 = vmax.f32 %v1537_v60, 0.0  ;;  %v3024_v37 = vpop.f32.mrb[106].mxu1 }
 0x1cc   :  { %v902_v18 = vadd.f32 %v4252_v15, %v2829_v32  ;;  %v896_v44 = vpop.f32.mrb[107].mxu0  ;;  %v2168_v55 = vadd.f32 %v2167_v5, %v1878_v40  ;;  %v1552_v54 = vadd.f32 %v4252_v15, %v3024_v37  ;;  %v1546_v49 = vpop.f32.mrb[107].mxu1 }
 0x1cd   :  { %v2019_v0 = vadd.f32 %v2018_v29, %v1749_v38  ;;  %v897_v47 = vadd.f32 %v4252_v15, %v896_v44  ;;  %v1547_v16 = vadd.f32 %v4252_v15, %v1546_v49 }
 0x1ce   :  { %v2169_v24 = vadd.f32 %v2168_v55, %v1879_v8  ;;  %v1752_v26 = vmax.f32 %v902_v18, 0.0  ;;  %v1882_v4 = vmax.f32 %v1552_v54, 0.0 }
 0x1cf   :  { %v1751_v52 = vmax.f32 %v897_v47, 0.0  ;;  %v2020_v50 = vadd.f32 %v2019_v0, %v1750_v2  ;;  %v2832_v63 = vpop.f32.mrb[108].mxu0  ;;  %v1881_v53 = vmax.f32 %v1547_v16, 0.0  ;;  %v3027_v12 = vpop.f32.mrb[108].mxu1 }
 0x1d0   :  { %v906_v23 = vpop.f32.mrb[109].mxu0  ;;  %v2170_v25 = vadd.f32 %v2169_v24, %v1880_v33  ;;  %v1562_v40 = vadd.f32 %v4252_v15, %v3027_v12  ;;  %v1556_v20 = vpop.f32.mrb[109].mxu1  ;;  %v912_v41 = vadd.f32 %v4252_v15, %v2832_v63 }
 0x1d1   :  { %v2021_v60 = vadd.f32 %v2020_v50, %v1751_v52  ;;  %v907_v5 = vadd.f32 %v4252_v15, %v906_v23  ;;  %v1557_v38 = vadd.f32 %v4252_v15, %v1556_v20 }
 0x1d2   :  { %v2171_v29 = vadd.f32 %v2170_v25, %v1881_v53  ;;  %v1884_v33 = vmax.f32 %v1562_v40, 0.0  ;;  %v1754_v47 = vmax.f32 %v912_v41, 0.0 }
 0x1d3   :  { %v1753_v32 = vmax.f32 %v907_v5, 0.0  ;;  %v2022_v8 = vadd.f32 %v2021_v60, %v1752_v26  ;;  %v2835_v37 = vpop.f32.mrb[110].mxu0  ;;  %v1883_v44 = vmax.f32 %v1557_v38, 0.0  ;;  %v3030_v55 = vpop.f32.mrb[110].mxu1 }
 0x1d4   :  { %v922_v18 = vadd.f32 %v4252_v15, %v2835_v37  ;;  %v916_v54 = vpop.f32.mrb[111].mxu0  ;;  %v2172_v49 = vadd.f32 %v2171_v29, %v1882_v4  ;;  %v1572_v2 = vadd.f32 %v4252_v15, %v3030_v55  ;;  %v1566_v0 = vpop.f32.mrb[111].mxu1 }
 0x1d5   :  { %v2023_v16 = vadd.f32 %v2022_v8, %v1753_v32  ;;  %v917_v24 = vadd.f32 %v4252_v15, %v916_v54  ;;  %v1567_v52 = vadd.f32 %v4252_v15, %v1566_v0 }
 0x1d6   :  { %v2173_v50 = vadd.f32 %v2172_v49, %v1883_v44  ;;  %v1756_v25 = vmax.f32 %v922_v18, 0.0  ;;  %v1886_v60 = vmax.f32 %v1572_v2, 0.0 }
 0x1d7   :  { %v1755_v63 = vmax.f32 %v917_v24, 0.0  ;;  %v2024_v53 = vadd.f32 %v2023_v16, %v1754_v47  ;;  %v2838_v12 = vpop.f32.mrb[112].mxu0  ;;  %v1885_v26 = vmax.f32 %v1567_v52, 0.0  ;;  %v3033_v23 = vpop.f32.mrb[112].mxu1 }
 0x1d8   :  { %v926_v20 = vpop.f32.mrb[113].mxu0  ;;  %v2174_v40 = vadd.f32 %v2173_v50, %v1884_v33  ;;  %v1582_v4 = vadd.f32 %v4252_v15, %v3033_v23  ;;  %v1576_v5 = vpop.f32.mrb[113].mxu1  ;;  %v932_v41 = vadd.f32 %v4252_v15, %v2838_v12 }
 0x1d9   :  { %v2025_v38 = vadd.f32 %v2024_v53, %v1755_v63  ;;  %v927_v29 = vadd.f32 %v4252_v15, %v926_v20  ;;  %v1577_v32 = vadd.f32 %v4252_v15, %v1576_v5 }
 0x1da   :  { %v2175_v8 = vadd.f32 %v2174_v40, %v1885_v26  ;;  %v1888_v33 = vmax.f32 %v1582_v4, 0.0  ;;  %v1758_v24 = vmax.f32 %v932_v41, 0.0 }
 0x1db   :  { %v1757_v37 = vmax.f32 %v927_v29, 0.0  ;;  %v2026_v44 = vadd.f32 %v2025_v38, %v1756_v25  ;;  %v2841_v55 = vpop.f32.mrb[114].mxu0  ;;  %v1887_v54 = vmax.f32 %v1577_v32, 0.0  ;;  %v3036_v49 = vpop.f32.mrb[114].mxu1 }
 0x1dc   :  { %v942_v18 = vadd.f32 %v4252_v15, %v2841_v55  ;;  %v936_v2 = vpop.f32.mrb[115].mxu0  ;;  %v2176_v0 = vadd.f32 %v2175_v8, %v1886_v60  ;;  %v1592_v47 = vadd.f32 %v4252_v15, %v3036_v49  ;;  %v1586_v16 = vpop.f32.mrb[115].mxu1 }
 0x1dd   :  { %v2027_v52 = vadd.f32 %v2026_v44, %v1757_v37  ;;  %v937_v50 = vadd.f32 %v4252_v15, %v936_v2  ;;  %v1587_v63 = vadd.f32 %v4252_v15, %v1586_v16 }
 0x1de   :  { %v2177_v53 = vadd.f32 %v2176_v0, %v1887_v54  ;;  %v1760_v40 = vmax.f32 %v942_v18, 0.0  ;;  %v1890_v38 = vmax.f32 %v1592_v47, 0.0 }
 0x1df   :  { %v1759_v12 = vmax.f32 %v937_v50, 0.0  ;;  %v2028_v26 = vadd.f32 %v2027_v52, %v1758_v24  ;;  %v2844_v23 = vpop.f32.mrb[116].mxu0  ;;  %v1889_v25 = vmax.f32 %v1587_v63, 0.0  ;;  %v3039_v20 = vpop.f32.mrb[116].mxu1 }
 0x1e0   :  { %v946_v5 = vpop.f32.mrb[117].mxu0  ;;  %v2178_v4 = vadd.f32 %v2177_v53, %v1888_v33  ;;  %v1602_v60 = vadd.f32 %v4252_v15, %v3039_v20  ;;  %v1596_v29 = vpop.f32.mrb[117].mxu1  ;;  %v952_v41 = vadd.f32 %v4252_v15, %v2844_v23 }
 0x1e1   :  { %v2029_v32 = vadd.f32 %v2028_v26, %v1759_v12  ;;  %v947_v8 = vadd.f32 %v4252_v15, %v946_v5  ;;  %v1597_v37 = vadd.f32 %v4252_v15, %v1596_v29 }
 0x1e2   :  { %v2179_v44 = vadd.f32 %v2178_v4, %v1889_v25  ;;  %v1892_v33 = vmax.f32 %v1602_v60, 0.0  ;;  %v1762_v50 = vmax.f32 %v952_v41, 0.0 }
 0x1e3   :  { %v1761_v55 = vmax.f32 %v947_v8, 0.0  ;;  %v2030_v54 = vadd.f32 %v2029_v32, %v1760_v40  ;;  %v2847_v49 = vpop.f32.mrb[118].mxu0  ;;  %v1891_v2 = vmax.f32 %v1597_v37, 0.0  ;;  %v3042_v0 = vpop.f32.mrb[118].mxu1 }
 0x1e4   :  { %v962_v18 = vadd.f32 %v4252_v15, %v2847_v49  ;;  %v956_v47 = vpop.f32.mrb[119].mxu0  ;;  %v2180_v16 = vadd.f32 %v2179_v44, %v1890_v38  ;;  %v1612_v24 = vadd.f32 %v4252_v15, %v3042_v0  ;;  %v1606_v52 = vpop.f32.mrb[119].mxu1 }
 0x1e5   :  { %v2031_v63 = vadd.f32 %v2030_v54, %v1761_v55  ;;  %v957_v53 = vadd.f32 %v4252_v15, %v956_v47  ;;  %v1607_v12 = vadd.f32 %v4252_v15, %v1606_v52 }
 0x1e6   :  { %v2181_v26 = vadd.f32 %v2180_v16, %v1891_v2  ;;  %v1764_v4 = vmax.f32 %v962_v18, 0.0  ;;  %v1894_v32 = vmax.f32 %v1612_v24, 0.0 }
 0x1e7   :  { %v1763_v23 = vmax.f32 %v957_v53, 0.0  ;;  %v2032_v25 = vadd.f32 %v2031_v63, %v1762_v50  ;;  %v2850_v20 = vpop.f32.mrb[120].mxu0  ;;  %v1893_v40 = vmax.f32 %v1607_v12, 0.0  ;;  %v3045_v5 = vpop.f32.mrb[120].mxu1  ;;  %v4402_v50 = vld [vmem:[%s4504_s2] ss:$0 sm:$0xff] }
 0x1e8   :  { %v966_v29 = vpop.f32.mrb[121].mxu0  ;;  %v2182_v60 = vadd.f32 %v2181_v26, %v1892_v33  ;;  %v1622_v38 = vadd.f32 %v4252_v15, %v3045_v5  ;;  %v1616_v8 = vpop.f32.mrb[121].mxu1  ;;  %v972_v41 = vadd.f32 %v4252_v15, %v2850_v20 }
 0x1e9   :  { %v2033_v37 = vadd.f32 %v2032_v25, %v1763_v23  ;;  %v967_v44 = vadd.f32 %v4252_v15, %v966_v29  ;;  %v1617_v55 = vadd.f32 %v4252_v15, %v1616_v8 }
 0x1ea   :  { %v2183_v54 = vadd.f32 %v2182_v60, %v1893_v40  ;;  %v1896_v33 = vmax.f32 %v1622_v38, 0.0  ;;  %v1766_v12 = vmax.f32 %v972_v41, 0.0 }
 0x1eb   :  { %v1765_v49 = vmax.f32 %v967_v44, 0.0  ;;  %v2034_v2 = vadd.f32 %v2033_v37, %v1764_v4  ;;  %v2853_v0 = vpop.f32.mrb[122].mxu0  ;;  %v1895_v47 = vmax.f32 %v1617_v55, 0.0  ;;  %v3048_v16 = vpop.f32.mrb[122].mxu1 }
 0x1ec   :  { %v982_v18 = vadd.f32 %v4252_v15, %v2853_v0  ;;  %v976_v24 = vpop.f32.mrb[123].mxu0  ;;  %v2184_v52 = vadd.f32 %v2183_v54, %v1894_v32  ;;  %v1632_v63 = vadd.f32 %v4402_v50, %v3048_v16  ;;  %v1626_v53 = vpop.f32.mrb[123].mxu1 }
 0x1ed   :  { %v2035_v26 = vadd.f32 %v2034_v2, %v1765_v49  ;;  %v977_v23 = vadd.f32 %v4402_v50, %v976_v24  ;;  %v1627_v25 = vadd.f32 %v4402_v50, %v1626_v53 }
 0x1ee   :  { %v2185_v20 = vadd.f32 %v2184_v52, %v1895_v47  ;;  %v1768_v32 = vmax.f32 %v982_v18, 0.0  ;;  %v1898_v38 = vmax.f32 %v1632_v63, 0.0 }
 0x1ef   :  { %v1767_v40 = vmax.f32 %v977_v23, 0.0  ;;  %v2036_v15 = vadd.f32 %v2035_v26, %v1766_v12  ;;  %v2856_v5 = vpop.f32.mrb[124].mxu0  ;;  %v1897_v4 = vmax.f32 %v1627_v25, 0.0  ;;  %v3051_v29 = vpop.f32.mrb[124].mxu1 }
 0x1f0   :  { %v986_v60 = vpop.f32.mrb[125].mxu0  ;;  %v2186_v8 = vadd.f32 %v2185_v20, %v1896_v33  ;;  %v1642_v37 = vadd.f32 %v4402_v50, %v3051_v29  ;;  %v1636_v44 = vpop.f32.mrb[125].mxu1  ;;  %v992_v41 = vadd.f32 %v4402_v50, %v2856_v5  ;;  %v1017_v29 = vadd.f32 %v4402_v50, %v3951_v62 }
 0x1f1   :  { %v2037_v55 = vadd.f32 %v2036_v15, %v1767_v40  ;;  %v987_v54 = vadd.f32 %v4402_v50, %v986_v60  ;;  %v1637_v49 = vadd.f32 %v4402_v50, %v1636_v44  ;;  %v1032_v62 = vadd.f32 %v4402_v50, %v3966_v7 }
 0x1f2   :  { %v2187_v2 = vadd.f32 %v2186_v8, %v1897_v4  ;;  %v1900_v18 = vmax.f32 %v1642_v37, 0.0  ;;  %v1770_v63 = vmax.f32 %v992_v41, 0.0  ;;  %v1022_v37 = vadd.f32 %v4402_v50, %v3948_v59 }
 0x1f3   :  { %v1769_v0 = vmax.f32 %v987_v54, 0.0  ;;  %v2038_v47 = vadd.f32 %v2037_v55, %v1768_v32  ;;  %v2859_v16 = vpop.f32.mrb[126].mxu0  ;;  %v1899_v24 = vmax.f32 %v1637_v49, 0.0  ;;  %v1775_v41 = vmax.f32 %v1017_v29, 0.0 }
 0x1f4   :  { %v996_v52 = vpop.f32.mrb[127].mxu0  ;;  %v2188_v53 = vadd.f32 %v2187_v2, %v1898_v38  ;;  %v1002_v12 = vadd.f32 %v4402_v50, %v2859_v16  ;;  %v1027_v54 = vadd.f32 %v4402_v50, %v3969_v9 }
 0x1f5   :  { %v2039_v33 = vadd.f32 %v2038_v47, %v1769_v0  ;;  %v997_v26 = vadd.f32 %v4402_v50, %v996_v52  ;;  %v1776_v0 = vmax.f32 %v1022_v37, 0.0  ;;  %v1037_v52 = vadd.f32 %v4402_v50, %v3987_v22 }
 0x1f6   :  { %v2189_v23 = vadd.f32 %v2188_v53, %v1899_v24  ;;  %v1772_v32 = vmax.f32 %v1002_v12, 0.0  ;;  %v1777_v24 = vmax.f32 %v1027_v54, 0.0  ;;  %v1778_v53 = vmax.f32 %v1032_v62, 0.0 }
 0x1f7   :  { %v1771_v25 = vmax.f32 %v997_v26, 0.0  ;;  %v2040_v20 = vadd.f32 %v2039_v33, %v1770_v63  ;;  %v2862_v40 = vpop.f32.mrb[128].mxu0  ;;  %v1042_v63 = vadd.f32 %v4402_v50, %v3985_v19  ;;  %v1779_v12 = vmax.f32 %v1037_v52, 0.0 }
 0x1f8   :  { %v1012_v15 = vadd.f32 %v4402_v50, %v2862_v40  ;;  %v1006_v5 = vpop.f32.mrb[129].mxu0  ;;  %v4414_v4 = vadd.f32 %v2189_v23, %v1900_v18  ;;  %v1047_v26 = vadd.f32 %v4402_v50, %v4005_v36  ;;  %v1077_v54 = vadd.f32 %v4402_v50, %v4059_v21 }
 0x1f9   :  { %v2041_v60 = vadd.f32 %v2040_v20, %v1771_v25  ;;  %v1007_v38 = vadd.f32 %v4402_v50, %v1006_v5  ;;  %v1780_v25 = vmax.f32 %v1042_v63, 0.0  ;;  %v1052_v20 = vadd.f32 %v4402_v50, %v4003_v34 }
 0x1fa   :  { %v1774_v8 = vmax.f32 %v1012_v15, 0.0  ;;  %v1781_v15 = vmax.f32 %v1047_v26, 0.0  ;;  %v1057_v5 = vadd.f32 %v4402_v50, %v4023_v51  ;;  %v1067_v34 = vadd.f32 %v4402_v50, %v4041_v3 }
 0x1fb   :  { %v2042_v44 = vadd.f32 %v2041_v60, %v1772_v32  ;;  %v1773_v55 = vmax.f32 %v1007_v38, 0.0  ;;  %v1782_v32 = vmax.f32 %v1052_v20, 0.0  ;;  %v1062_v60 = vadd.f32 %v4402_v50, %v4021_v48 }
 0x1fc   :  { %v1087_v3 = vadd.f32 %v4402_v50, %v4080_v39  ;;  %v1097_v21 = vadd.f32 %v4402_v50, %v4101_v58  ;;  %v1107_v39 = vadd.f32 %v4402_v50, %v4117_v13  ;;  %v1117_v58 = vadd.f32 %v4402_v50, %v4129_v30 }
 0x1fd   :  { %v2043_v49 = vrot.slane %v2042_v44, 4  ;;  %v2049_v2 = vadd.f32 %v1774_v8, %v1773_v55  ;;  %v1783_v8 = vmax.f32 %v1057_v5, 0.0  ;;  %v1072_v55 = vadd.f32 %v4402_v50, %v4039_v1 }
 0x1fe   :  { %v1092_v1 = vadd.f32 %v4402_v50, %v4075_v35  ;;  %v1112_v35 = vadd.f32 %v4402_v50, %v4114_v11  ;;  %v1127_v13 = vadd.f32 %v4402_v50, %v4138_v45  ;;  %v1132_v11 = vadd.f32 %v4402_v50, %v4136_v43 }
 0x1ff   :  { %v2044_v47 = vadd.f32 %v2043_v49, %v2042_v44  ;;  %v2050_v16 = vadd.f32 %v2049_v2, %v1775_v41  ;;  %v1784_v44 = vmax.f32 %v1062_v60, 0.0  ;;  %v1785_v41 = vmax.f32 %v1067_v34, 0.0 }
 0x200   :  { %v1786_v48 = vmax.f32 %v1072_v55, 0.0  ;;  %v1137_v30 = vadd.f32 %v4402_v50, %v4144_v61  ;;  %v1147_v45 = vadd.f32 %v4402_v50, %v4150_v14  ;;  %v1152_v43 = vadd.f32 %v4402_v50, %v4148_v10 }
 0x201   :  { %v2045_v18 = vrot.slane %v2044_v47, 2  ;;  %v2051_v59 = vadd.f32 %v2050_v16, %v1776_v0  ;;  %v1787_v0 = vmax.f32 %v1077_v54, 0.0  ;;  %v2117_v34 = vrot.slane %v4259_v46, 4 }
 0x202   :  { %v1157_v61 = vadd.f32 %v4402_v50, %v4156_v31  ;;  %v2191_v55 = vrot.slane %v4414_v4, 4  ;;  %v1162_v14 = vadd.f32 %v4402_v50, %v4154_v27 }
 0x203   :  { %v2046_v33 = vadd.f32 %v2045_v18, %v2044_v47  ;;  %v2052_v9 = vadd.f32 %v2051_v59, %v1777_v24  ;;  %v1789_v24 = vmax.f32 %v1087_v3, 0.0  ;;  %v1790_v18 = vmax.f32 %v1092_v1, 0.0 }
 0x204   :  { %v2118_v54 = vadd.f32 %v2117_v34, %v4259_v46  ;;  %v1803_v10 = vmax.f32 %v1157_v61, 0.0 }
 0x205   :  { %v2047_v23 = vrot.slane %v2046_v33, 1  ;;  %v2053_v7 = vadd.f32 %v2052_v9, %v1778_v53  ;;  %v1791_v53 = vmax.f32 %v1097_v21, 0.0 }
 0x207   :  { %v2048_v40 = vadd.f32 %v2047_v23, %v2046_v33  ;;  %v2054_v22 = vadd.f32 %v2053_v7, %v1779_v12  ;;  %v1793_v12 = vmax.f32 %v1107_v39, 0.0  ;;  %v1794_v23 = vmax.f32 %v1112_v35, 0.0 }
 0x209   :  { %v2200_v19 = vmul.f32 0.00390625, %v2048_v40  ;;  %v2055_v29 = vadd.f32 %v2054_v22, %v1780_v25  ;;  %v1795_v25 = vmax.f32 %v1117_v58, 0.0 }
 0x20b   :  { %v2056_v36 = vadd.f32 %v2055_v29, %v1781_v15  ;;  %v4438_v38 = vsel %vm2240_vm3, %v2200_v19, %v4364_v6  ;;  %v1082_v6 = vadd.f32 %v4402_v50, %v4057_v17  ;;  %v1102_v17 = vadd.f32 %v4402_v50, %v4099_v56 }
 0x20c   :  { %v1122_v56 = vadd.f32 %v4402_v50, %v4127_v28  ;;  %v1797_v15 = vmax.f32 %v1127_v13, 0.0  ;;  %v1798_v19 = vmax.f32 %v1132_v11, 0.0  ;;  %v1142_v28 = vadd.f32 %v4402_v50, %v4142_v57 }
 0x20d   :  { %v2057_v37 = vadd.f32 %v2056_v36, %v1782_v32  ;;  %v1788_v47 = vmax.f32 %v1082_v6, 0.0  ;;  %v1792_v33 = vmax.f32 %v1102_v17, 0.0  ;;  %v1799_v32 = vmax.f32 %v1137_v30, 0.0 }
 0x20e   :  { %v1796_v40 = vmax.f32 %v1122_v56, 0.0  ;;  %v1800_v36 = vmax.f32 %v1142_v28, 0.0  ;;  %v2192_v6 = vadd.f32 %v2191_v55, %v4414_v4  ;;  %v2346_v56 = vld [vmem:[%s4506_s4] ss:$0 sm:$0xff] }
 0x20f   :  { %v2058_v51 = vadd.f32 %v2057_v37, %v1783_v8  ;;  %v1801_v37 = vmax.f32 %v1147_v45, 0.0 }
 0x211   :  { %v2059_v49 = vadd.f32 %v2058_v51, %v1784_v44  ;;  %v2154_v44 = vrot.slane %v4341_v42, 4  ;;  %v1802_v51 = vmax.f32 %v1152_v43, 0.0 }
 0x213   :  { %v2060_v2 = vadd.f32 %v2059_v49, %v1785_v41  ;;  %v2155_v49 = vadd.f32 %v2154_v44, %v4341_v42 }
 0x215   :  { %v2061_v62 = vadd.f32 %v2060_v2, %v1786_v48  ;;  %v1804_v2 = vmax.f32 %v1162_v14, 0.0  ;;  %v2156_v3 = vrot.slane %v2155_v49, 2 }
 0x217   :  { %v2062_v16 = vadd.f32 %v2061_v62, %v1787_v0  ;;  %v2119_v0 = vrot.slane %v2118_v54, 2 }
 0x219   :  { %v2063_v52 = vadd.f32 %v2062_v16, %v1788_v47  ;;  %v2193_v47 = vrot.slane %v2192_v6, 2  ;;  %v2120_v16 = vadd.f32 %v2119_v0, %v2118_v54 }
 0x21b   :  { %v2064_v59 = vadd.f32 %v2063_v52, %v1789_v24  ;;  %v2157_v24 = vadd.f32 %v2156_v3, %v2155_v49  ;;  %v2194_v27 = vadd.f32 %v2193_v47, %v2192_v6  ;;  %v2121_v52 = vrot.slane %v2120_v16, 1 }
 0x21d   :  { %v2065_v63 = vadd.f32 %v2064_v59, %v1790_v18  ;;  %v2158_v46 = vrot.slane %v2157_v24, 1  ;;  %v2195_v17 = vrot.slane %v2194_v27, 1  ;;  %v2122_v59 = vadd.f32 %v2121_v52, %v2120_v16 }
 0x21f   :  { %v2066_v9 = vadd.f32 %v2065_v63, %v1791_v53  ;;  %v2159_v53 = vadd.f32 %v2158_v46, %v2157_v24  ;;  %v2196_v39 = vadd.f32 %v2195_v17, %v2194_v27 }
 0x221   :  { %v2067_v26 = vadd.f32 %v2066_v9, %v1792_v33  ;;  %v2202_v33 = vmul.f32 0.00390625, %v2122_v59  ;;  %v2203_v35 = vmul.f32 0.00390625, %v2159_v53 }
 0x223   :  { %v2068_v7 = vadd.f32 %v2067_v26, %v1793_v12  ;;  %v2204_v12 = vmul.f32 0.00390625, %v2196_v39 }
 0x225   :  { %v2069_v20 = vadd.f32 %v2068_v7, %v1794_v23 }
 0x227   :  { %v2070_v22 = vadd.f32 %v2069_v20, %v1795_v25 }
 0x229   :  { %v2071_v5 = vadd.f32 %v2070_v22, %v1796_v40 }
 0x22b   :  { %v2072_v29 = vadd.f32 %v2071_v5, %v1797_v15 }
 0x22d   :  { %v2073_v60 = vadd.f32 %v2072_v29, %v1798_v19 }
 0x22f   :  { %v2074_v8 = vadd.f32 %v2073_v60, %v1799_v32 }
 0x231   :  { %v2075_v57 = vadd.f32 %v2074_v8, %v1800_v36 }
 0x233   :  { %v2076_v41 = vadd.f32 %v2075_v57, %v1801_v37 }
 0x235   :  { %v2077_v48 = vadd.f32 %v2076_v41, %v1802_v51 }
 0x237   :  { %v2078_v31 = vadd.f32 %v2077_v48, %v1803_v10 }
 0x239   :  { %v2079_v62 = vadd.f32 %v2078_v31, %v1804_v2 }
 0x23b   :  { %v2080_v1 = vrot.slane %v2079_v62, 4 }
 0x23d   :  { %v2081_v21 = vadd.f32 %v2080_v1, %v2079_v62 }
 0x23f   :  { %v2082_v50 = vrot.slane %v2081_v21, 2 }
 0x241   :  { %v2083_v18 = vadd.f32 %v2082_v50, %v2081_v21 }
 0x243   :  { %v2084_v42 = vrot.slane %v2083_v18, 1 }
 0x245   :  { %v2085_v4 = vadd.f32 %v2084_v42, %v2083_v18 }
 0x247   :  { %v2201_v63 = vmul.f32 0.00390625, %v2085_v4 }
 0x249   :  { %v2243_v9 = vsel %vm2242_vm4, %v2201_v63, %v4438_v38 }
 0x24a   :  { %v2245_v58 = vsel %vm2244_vm5, %v2202_v33, %v2243_v9 }
 0x24b   :  { %v2247_v26 = vsel %vm2246_vm6, %v2203_v35, %v2245_v58 }
 0x24c   :  { %v2249_v23 = vsel %vm2248_vm7, %v2204_v12, %v2247_v26 }
 0x24d   :  { %3085 = vmatmul.mubr.f32.vlgmr.msra.gmra.mrb[126].mxu1 %v2249_v23 }
 0x320   :  { %v2317_v7 = vpop.f32.mrb[126].mxu1 }
 0x321   :  { %v2318_v25 = vadd.f32 %v2346_v56, %v2317_v7  ;;  %v3086_v13 = vpop.f32.mrb[127].mxu1 }
 0x323   :  { %2321 = vmax.xlane.f32.xlu0 %v2318_v25 }
 0x3b0   :  { %v2322_v20 = vpop.xlane.xlu0 %2321 }
 0x3b1   :  { %v2323_v40 = vsub.f32 %v2318_v25, %v2322_v20 }
 0x3b3   :  { %v2324_v11 = vmul.f32 1.442695, %v2323_v40 }
 0x3b5   :  { %3163 = vpow2.f32 %v2324_v11 }
 0x3bf   :  { %v3164_v22 = vpop.eup %3163 }
 0x3c0   :  { %2326 = vadd.xlane.f32.xlu0 %v3164_v22 }
 0x44d   :  { %v2327_v38 = vpop.xlane.xlu0 %2326 }
 0x44e   :  { %3165 = vrcp.f32 %v2327_v38 }
 0x458   :  { %v3166_v15 = vpop.eup %3165 }
 0x459   :  { %v2329_v30 = vmul.f32 %v3166_v15, %v3164_v22 }
 0x45b   :  { %2330 = vst [vmem:[#allocation2] sm:$0xff] %v2329_v30 }
 0x45c   :  { %3180 = shalt.err (!%p3177_p4)
}
 0x45d   :  { %s3181_s6 = scalar_lea.hbm %s4507_s5, 128 }
 0x45e   :  { %p3182_p5 = scmp.ne.s32.totalorder %s4507_s5, %s3181_s6  ;;  %p3185_p6 = scmp.lt.u32.totalorder %s3181_s6, %s4507_s5 }
 0x460   :  { %p3187_p7 = pnand %p3185_p6, %p3182_p5 }
 0x462   :  { %3190 = shalt.err (!%p3187_p7)
}
 0x463   :  { %2340 = dma.vmem_to_hbm [thread:$0]  %s2338_s29, 128, %s4507_s5, [#allocation3]  }
 0x464   :  { %3191 = dma.done.wait [#allocation3], 128  }
 0x465   :  { %3192 = vsyncadd [#allocation3], 4294967168 }
 0x466   :  { %2344 = vsyncpa [#allocation3], 1 }

</bundles_post_ra>
